<compile_context>
chip_gen: v5e
topology: v5e:2x2
jax: 0.10.0
libtpu: 0.0.40
codegen_flags: <defaults>
</compile_context>

<pallas_src>
import functools

import jax
import jax.numpy as jnp
from jax import lax
from jax.experimental import pallas as pl
from jax.experimental.pallas import tpu as pltpu


def _gatv2_kernel(emb_ref, bias_ref, wp_ref, wl_ref, ablk_ref, adj_ref,
                  out_ref, *, neg_slope, n_heads, mxu_dtype):
    """Bt graphs per grid step; everything VMEM-resident."""
    bt, n_nodes, _ = emb_ref.shape
    hd = wl_ref.shape[1]                      # n_heads * d_head
    d_head = hd // n_heads
    cast = lambda a: a.astype(mxu_dtype)

    # projection_layer: Linear(in + cond -> 2*in); the conditioning term is
    # pre-folded into bias_ref on the host.  One MXU contraction over Bt*N rows.
    h = lax.dot_general(cast(emb_ref[...]), cast(wp_ref[...]),
                        (((2,), (0,)), ((), ())),
                        preferred_element_type=jnp.float32)        # [Bt, N, 2*in]
    h = h + bias_ref[...]                                          # [Bt, 1, 2*in] bcast

    # linear_l == linear_r (share_weights=True): g_l = g_r = g
    g = lax.dot_general(cast(h), cast(wl_ref[...]),
                        (((2,), (0,)), ((), ())),
                        preferred_element_type=jnp.float32)        # [Bt, N, H*D]

    ablk = cast(ablk_ref[...])                                     # [H*D, H] block-diag
    adj = adj_ref[...]                                             # [Bt, N, N]

    for gi in range(bt):                     # static unroll; Bt is small
        gg = g[gi]                                                 # [N, H*D]
        # GATv2 scores: s[i, j, :] = g[i] + g[j]; a single LeakyReLU.
        s = gg[:, None, :] + gg[None, :, :]                        # [N, N, H*D]
        act = jnp.where(s >= 0, s, neg_slope * s)
        # e[i, j, h] = <act[i, j, h*D:(h+1)*D], a>: one plain MXU contraction
        # against the block-diagonal attention matrix (M = N*N rows).
        e = lax.dot_general(cast(act), ablk, (((2,), (0,)), ((), ())),
                            preferred_element_type=jnp.float32)    # [N, N, H]

        # Lane-dense masked softmax over neighbours j (last axis).
        et = jnp.transpose(e, (0, 2, 1))                           # [N, H, N]
        mask = adj[gi][:, None, :] != 0.0                          # [N, 1, N]
        em = jnp.where(mask, et, jnp.float32(-1e30))               # masked max
        m = jnp.max(em, axis=-1, keepdims=True)                    # [N, H, 1]
        p = jnp.where(mask, jnp.exp(em - m), 0.0)                  # [N, H, N]
        denom = jnp.maximum(jnp.sum(p, axis=-1, keepdims=True), jnp.float32(1e-30))
        a_w = p / denom                                            # exact divide
        # TODO(synk): dropout on attention weights skipped (eval mode => identity).

        # Aggregation: head-batched MXU contraction over neighbours j.
        g_heads = gg.reshape(n_nodes, n_heads, d_head)             # [N(j), H, D]
        out_hnd = lax.dot_general(cast(a_w), cast(g_heads),
                                  (((2,), (0,)), ((1,), (1,))),
                                  preferred_element_type=jnp.float32)   # [H, N(i), D]
        out_g = jnp.transpose(out_hnd, (1, 0, 2)).reshape(n_nodes, hd)  # [N, H*D]
        out_ref[gi] = out_g.astype(out_ref.dtype)                  # lane-dense store


def modified_gatv2_forward_batched(x_idx_b, adj_b, cond_b, params, *, n_heads,
                                   graphs_per_step=None, mxu_dtype=jnp.float32):
    """B independent graphs through one pallas_call (Bt graphs per grid step)."""
    emb_table = params["embedding"]                            # [vocab, in_features]
    in_features = emb_table.shape[1]
    w_proj = params["w_proj"]                                  # [in+cond, 2*in]
    b_proj = params["b_proj"]                                  # [2*in]
    wl = params["w_l"]                                         # [2*in, n_hidden]
    attn = params["attn"]                                      # [1, d_head]

    n_hidden = wl.shape[1]
    batch, n_nodes = x_idx_b.shape[0], x_idx_b.shape[1]

    if graphs_per_step is None:
        # Fold several graphs per grid step (amortise ~0.35us/step overhead)
        # but keep >= 2 grid steps so both v7x TensorCores get work.
        graphs_per_step = batch // 2 if (batch % 2 == 0 and batch >= 4) else batch
    assert batch % graphs_per_step == 0
    bt = graphs_per_step
    n_steps = batch // bt

    # --- cheap host-side glue (fuses into the surrounding XLA graph) ---
    # nn.Embedding gather
    node_emb = jnp.take(emb_table, x_idx_b[..., 0].astype(jnp.int32), axis=0)  # [B,N,in]
    # fold conditioning into the projection bias: cat(emb, cond) @ W + b
    #   == emb @ W[:in] + (cond @ W[in:] + b)
    wp_emb = w_proj[:in_features, :]
    wp_cond = w_proj[in_features:, :]
    bias_eff = (cond_b.astype(jnp.float32) @ wp_cond + b_proj)[:, None, :]     # [B,1,2in]
    adj = adj_b.astype(jnp.float32)
    if adj.ndim == 4:
        # TODO(synk): per-head adjacency ([N,N,n_heads]) not supported; shared mask only.
        assert adj.shape[-1] == 1, "only [N, N, 1] adjacency supported"
        adj = adj[..., 0]                                                      # [B,N,N]

    # block-diagonal attention matrix [H*D, H] (shared attn vector per head)
    ablk = jnp.kron(jnp.eye(n_heads, dtype=jnp.float32), attn[0][:, None])

    kernel = functools.partial(_gatv2_kernel, neg_slope=0.2, n_heads=n_heads,
                               mxu_dtype=mxu_dtype)
    return pl.pallas_call(
        kernel,
        out_shape=jax.ShapeDtypeStruct((batch, n_nodes, n_hidden), jnp.float32),
        grid=(n_steps,),
        in_specs=[
            pl.BlockSpec((bt, n_nodes, node_emb.shape[-1]), lambda i: (i, 0, 0)),
            pl.BlockSpec((bt, 1, bias_eff.shape[-1]), lambda i: (i, 0, 0)),
            pl.BlockSpec(wp_emb.shape, lambda i: (0, 0)),   # weights stay VMEM-resident
            pl.BlockSpec(wl.shape, lambda i: (0, 0)),
            pl.BlockSpec(ablk.shape, lambda i: (0, 0)),
            pl.BlockSpec((bt, n_nodes, n_nodes), lambda i: (i, 0, 0)),
        ],
        out_specs=pl.BlockSpec((bt, n_nodes, n_hidden), lambda i: (i, 0, 0)),
        compiler_params=pltpu.CompilerParams(dimension_semantics=("parallel",)),
    )(node_emb, bias_eff, wp_emb, wl, ablk, adj)


def modified_gatv2_forward(x_idx, adj_mat, conditioning_input, params, *, n_heads):
    """Module-faithful single-graph forward (batch of 1)."""
    out = modified_gatv2_forward_batched(x_idx[None], adj_mat[None],
                                         conditioning_input[None], params,
                                         n_heads=n_heads)
    return out[0]


def _reference_jax(x_idx, adj_mat, conditioning_input, params, *, n_heads):
    """Pure-JAX mirror of the PyTorch forward for correctness checking."""
    emb_table = params["embedding"]
    node_emb = jnp.take(emb_table, x_idx[:, 0].astype(jnp.int32), axis=0)
    n_nodes = node_emb.shape[0]
    cond_rep = jnp.broadcast_to(conditioning_input[None, :],
                                (n_nodes, conditioning_input.shape[0]))
    h = jnp.concatenate([node_emb, cond_rep], axis=-1) @ params["w_proj"] + params["b_proj"]
    n_hidden = params["w_l"].shape[1]
    d_head = n_hidden // n_heads
    g = (h @ params["w_l"]).reshape(n_nodes, n_heads, d_head)
    g_sum = g[None, :, :, :] + g[:, None, :, :]       # g_l[j] + g_r[i]
    act = jnp.where(g_sum >= 0, g_sum, 0.2 * g_sum)
    e = jnp.einsum("ijhd,d->ijh", act, params["attn"][0])
    adj = adj_mat.astype(jnp.float32)                  # [N, N, 1] broadcasts over heads
    e = jnp.where(adj == 0.0, -jnp.inf, e)
    e = e - jnp.max(e, axis=1, keepdims=True)
    p = jnp.exp(e)
    a = p / jnp.sum(p, axis=1, keepdims=True)
    out = jnp.einsum("ijh,jhd->ihd", a, g)
    return out.reshape(n_nodes, n_heads * d_head)


if __name__ == "__main__":
    vocab_size = 20
    in_features = 16
    cond_dim = 16            # opt.condition_propagation_dim
    n_hidden = 32
    n_heads = 4
    n_nodes = 10
    batch = 4
    layer_in = in_features * 2
    d_head = n_hidden // n_heads

    key = jax.random.PRNGKey(0)
    (k_emb, k_wp, k_bp, k_wl, k_attn,
     k_x, k_adj, k_cond, k_xb, k_adjb, k_condb) = jax.random.split(key, 11)

    params = {
        "embedding": 0.1 * jax.random.normal(k_emb, (vocab_size, in_features), jnp.float32),
        "w_proj":    0.1 * jax.random.normal(k_wp, (in_features + cond_dim, layer_in), jnp.float32),
        "b_proj":    0.1 * jax.random.normal(k_bp, (layer_in,), jnp.float32),
        "w_l":       0.1 * jax.random.normal(k_wl, (layer_in, n_hidden), jnp.float32),
        "attn":      0.1 * jax.random.normal(k_attn, (1, d_head), jnp.float32),
    }

    # --- single graph (module semantics) ---
    x_idx = jax.random.randint(k_x, (n_nodes, 1), 0, vocab_size, jnp.int32)
    adj = (jax.random.uniform(k_adj, (n_nodes, n_nodes)) > 0.5).astype(jnp.float32)
    adj = jnp.maximum(adj, jnp.eye(n_nodes, dtype=jnp.float32))[:, :, None]
    cond = jax.random.normal(k_cond, (cond_dim,), jnp.float32)

    out = jax.block_until_ready(
        modified_gatv2_forward(x_idx, adj, cond, params, n_heads=n_heads))
    ref = _reference_jax(x_idx, adj, cond, params, n_heads=n_heads)
    assert out.shape == (n_nodes, n_hidden)
    assert jnp.allclose(out, ref, atol=1e-3, rtol=1e-3), "single-graph mismatch vs reference"

    # --- batched graphs through one grid-parallel pallas_call (2 graphs/step) ---
    x_b = jax.random.randint(k_xb, (batch, n_nodes, 1), 0, vocab_size, jnp.int32)
    adj_b = (jax.random.uniform(k_adjb, (batch, n_nodes, n_nodes)) > 0.5).astype(jnp.float32)
    adj_b = jnp.maximum(adj_b, jnp.eye(n_nodes, dtype=jnp.float32)[None])[:, :, :, None]
    cond_b = jax.random.normal(k_condb, (batch, cond_dim), jnp.float32)

    out_b = jax.block_until_ready(
        modified_gatv2_forward_batched(x_b, adj_b, cond_b, params, n_heads=n_heads))
    ref_b = jnp.stack([_reference_jax(x_b[i], adj_b[i], cond_b[i], params, n_heads=n_heads)
                       for i in range(batch)])
    assert out_b.shape == (batch, n_nodes, n_hidden)
    assert jnp.allclose(out_b, ref_b, atol=1e-3, rtol=1e-3), "batched mismatch vs reference"

    print("KERNEL_OK")
</pallas_src>

<mosaic_0001>
module attributes {stable_mosaic.version = 11 : i64} {
  func.func @_gatv2_kernel(%arg0: i32, %arg1: memref<1x10x16xf32, #tpu.memory_space<vmem>>, %arg2: memref<1x1x32xf32, #tpu.memory_space<vmem>>, %arg3: memref<16x32xf32, #tpu.memory_space<vmem>>, %arg4: memref<32x32xf32, #tpu.memory_space<vmem>>, %arg5: memref<32x4xf32, #tpu.memory_space<vmem>>, %arg6: memref<1x10x10xf32, #tpu.memory_space<vmem>>, %arg7: memref<1x10x32xf32, #tpu.memory_space<vmem>>) attributes {dimension_semantics = [#tpu.dimension_semantics<parallel>], iteration_bounds = array<i64: 1>, scalar_prefetch = 0 : i64, scratch_operands = 0 : i64, tpu.core_type = #tpu.core_type<tc>, window_params = [{transform_indices = @transform_0, window_bounds = array<i64: 1, 10, 16>}, {transform_indices = @transform_1, window_bounds = array<i64: 1, 1, 32>}, {pipeline_mode = #tpu.pipeline_mode<synchronous>, transform_indices = @transform_2, window_bounds = array<i64: 16, 32>}, {pipeline_mode = #tpu.pipeline_mode<synchronous>, transform_indices = @transform_3, window_bounds = array<i64: 32, 32>}, {pipeline_mode = #tpu.pipeline_mode<synchronous>, transform_indices = @transform_4, window_bounds = array<i64: 32, 4>}, {transform_indices = @transform_5, window_bounds = array<i64: 1, 10, 10>}, {transform_indices = @transform_6, window_bounds = array<i64: 1, 10, 32>}]} {
    %c0 = arith.constant 0 : index
    %c0_0 = arith.constant 0 : index
    %c0_1 = arith.constant 0 : index
    %0 = vector.load %arg1[%c0, %c0_0, %c0_1] : memref<1x10x16xf32, #tpu.memory_space<vmem>>, vector<1x10x16xf32>
    %c0_2 = arith.constant 0 : index
    %c0_3 = arith.constant 0 : index
    %1 = vector.load %arg3[%c0_2, %c0_3] : memref<16x32xf32, #tpu.memory_space<vmem>>, vector<16x32xf32>
    %cst = arith.constant dense<0.000000e+00> : vector<1x10x32xf32>
    %2 = tpu.matmul %0, %1, %cst {dimension_numbers = #tpu.dot_dimension_numbers<[2], [0], [0, 1], [1], [0, 0, 0, 1, 1, 1], [], []>} : vector<1x10x16xf32>, vector<16x32xf32>, vector<1x10x32xf32> -> vector<1x10x32xf32>
    %c0_4 = arith.constant 0 : index
    %c0_5 = arith.constant 0 : index
    %c0_6 = arith.constant 0 : index
    %3 = vector.load %arg2[%c0_4, %c0_5, %c0_6] : memref<1x1x32xf32, #tpu.memory_space<vmem>>, vector<1x1x32xf32>
    %4 = vector.broadcast %3 : vector<1x1x32xf32> to vector<1x10x32xf32>
    %5 = arith.addf %2, %4 : vector<1x10x32xf32>
    %c0_7 = arith.constant 0 : index
    %c0_8 = arith.constant 0 : index
    %6 = vector.load %arg4[%c0_7, %c0_8] : memref<32x32xf32, #tpu.memory_space<vmem>>, vector<32x32xf32>
    %cst_9 = arith.constant dense<0.000000e+00> : vector<1x10x32xf32>
    %7 = tpu.matmul %5, %6, %cst_9 {dimension_numbers = #tpu.dot_dimension_numbers<[2], [0], [0, 1], [1], [0, 0, 0, 1, 1, 1], [], []>} : vector<1x10x32xf32>, vector<32x32xf32>, vector<1x10x32xf32> -> vector<1x10x32xf32>
    %c0_10 = arith.constant 0 : index
    %c0_11 = arith.constant 0 : index
    %8 = vector.load %arg5[%c0_10, %c0_11] : memref<32x4xf32, #tpu.memory_space<vmem>>, vector<32x4xf32>
    %c0_12 = arith.constant 0 : index
    %c0_13 = arith.constant 0 : index
    %c0_14 = arith.constant 0 : index
    %9 = vector.load %arg6[%c0_12, %c0_13, %c0_14] : memref<1x10x10xf32, #tpu.memory_space<vmem>>, vector<1x10x10xf32>
    %10 = vector.shape_cast %7 : vector<1x10x32xf32> to vector<10x32xf32>
    %11 = vector.shape_cast %10 : vector<10x32xf32> to vector<10x1x32xf32>
    %12 = vector.shape_cast %10 : vector<10x32xf32> to vector<1x10x32xf32>
    %13 = vector.broadcast %11 : vector<10x1x32xf32> to vector<10x10x32xf32>
    %14 = vector.broadcast %12 : vector<1x10x32xf32> to vector<10x10x32xf32>
    %15 = arith.addf %13, %14 : vector<10x10x32xf32>
    %cst_15 = arith.constant 0.000000e+00 : f32
    %16 = vector.broadcast %cst_15 : f32 to vector<10x10x32xf32>
    %17 = arith.cmpf oge, %15, %16 : vector<10x10x32xf32>
    %cst_16 = arith.constant 2.000000e-01 : f32
    %18 = vector.broadcast %cst_16 : f32 to vector<10x10x32xf32>
    %19 = arith.mulf %18, %15 : vector<10x10x32xf32>
    %20 = arith.select %17, %15, %19 : vector<10x10x32xi1>, vector<10x10x32xf32>
    %cst_17 = arith.constant dense<0.000000e+00> : vector<10x10x4xf32>
    %21 = tpu.matmul %20, %8, %cst_17 {dimension_numbers = #tpu.dot_dimension_numbers<[2], [0], [0, 1], [1], [0, 0, 0, 1, 1, 1], [], []>} : vector<10x10x32xf32>, vector<32x4xf32>, vector<10x10x4xf32> -> vector<10x10x4xf32>
    %22 = tpu.transpose %21, [0, 2, 1] : vector<10x10x4xf32> -> vector<10x4x10xf32>
    %23 = vector.shape_cast %9 : vector<1x10x10xf32> to vector<10x10xf32>
    %24 = vector.shape_cast %23 : vector<10x10xf32> to vector<10x1x10xf32>
    %cst_18 = arith.constant 0.000000e+00 : f32
    %25 = vector.broadcast %cst_18 : f32 to vector<10x1x10xf32>
    %26 = arith.cmpf one, %24, %25 : vector<10x1x10xf32>
    %cst_19 = arith.constant -1.000000e+30 : f32
    %27 = vector.shape_cast %26 : vector<10x1x10xi1> to vector<10x1x10xi1>
    %28 = vector.broadcast %27 : vector<10x1x10xi1> to vector<10x4x10xi1>
    %29 = vector.broadcast %cst_19 : f32 to vector<10x4x10xf32>
    %30 = arith.select %28, %22, %29 : vector<10x4x10xi1>, vector<10x4x10xf32>
    %cst_20 = arith.constant dense<0xFF800000> : vector<10x4xf32>
    %31 = vector.multi_reduction <maximumf>, %30, %cst_20 [2] : vector<10x4x10xf32> to vector<10x4xf32>
    %32 = vector.shape_cast %31 : vector<10x4xf32> to vector<10x4x1xf32>
    %33 = vector.broadcast %32 : vector<10x4x1xf32> to vector<10x4x10xf32>
    %34 = arith.subf %30, %33 : vector<10x4x10xf32>
    %35 = math.exp %34 : vector<10x4x10xf32>
    %cst_21 = arith.constant 0.000000e+00 : f32
    %36 = vector.shape_cast %26 : vector<10x1x10xi1> to vector<10x1x10xi1>
    %37 = vector.broadcast %36 : vector<10x1x10xi1> to vector<10x4x10xi1>
    %38 = vector.broadcast %cst_21 : f32 to vector<10x4x10xf32>
    %39 = arith.select %37, %35, %38 : vector<10x4x10xi1>, vector<10x4x10xf32>
    %cst_22 = arith.constant dense<0.000000e+00> : vector<10x4xf32>
    %40 = vector.multi_reduction <add>, %39, %cst_22 [2] : vector<10x4x10xf32> to vector<10x4xf32>
    %41 = vector.shape_cast %40 : vector<10x4xf32> to vector<10x4x1xf32>
    %cst_23 = arith.constant 1.000000e-30 : f32
    %42 = vector.broadcast %cst_23 : f32 to vector<10x4x1xf32>
    %43 = arith.maximumf %41, %42 : vector<10x4x1xf32>
    %44 = vector.broadcast %43 : vector<10x4x1xf32> to vector<10x4x10xf32>
    %45 = arith.divf %39, %44 : vector<10x4x10xf32>
    %46 = vector.shape_cast %10 : vector<10x32xf32> to vector<10x4x8xf32>
    %cst_24 = arith.constant dense<0.000000e+00> : vector<4x10x8xf32>
    %47 = tpu.matmul %45, %46, %cst_24 {dimension_numbers = #tpu.dot_dimension_numbers<[2], [0], [0], [2], [0, 1, 0, 0, 1, 2], [1], [1]>} : vector<10x4x10xf32>, vector<10x4x8xf32>, vector<4x10x8xf32> -> vector<4x10x8xf32>
    %48 = tpu.transpose %47, [1, 0, 2] : vector<4x10x8xf32> -> vector<10x4x8xf32>
    %49 = vector.shape_cast %48 : vector<10x4x8xf32> to vector<10x32xf32>
    %c0_25 = arith.constant 0 : index
    %c0_26 = arith.constant 0 : index
    %c0_27 = arith.constant 0 : index
    %50 = vector.load %arg7[%c0_25, %c0_26, %c0_27] : memref<1x10x32xf32, #tpu.memory_space<vmem>>, vector<1x10x32xf32>
    %51 = vector.shape_cast %50 : vector<1x10x32xf32> to vector<10x32xf32>
    %52 = vector.shape_cast %49 : vector<10x32xf32> to vector<1x10x32xf32>
    tpu.vector_store %arg7[%c0_25, %c0_26, %c0_27], %52 {strides = array<i32>} : memref<1x10x32xf32, #tpu.memory_space<vmem>>, vector<1x10x32xf32>,
    return
  }
  func.func @transform_0(%arg0: i32) -> (i32, i32, i32) {
    %c0_i32 = arith.constant 0 : i32
    %c0_i32_0 = arith.constant 0 : i32
    %c0_i32_1 = arith.constant 0 : i32
    return %arg0, %c0_i32, %c0_i32_0 : i32, i32, i32
  }
  func.func @transform_1(%arg0: i32) -> (i32, i32, i32) {
    %c0_i32 = arith.constant 0 : i32
    %c0_i32_0 = arith.constant 0 : i32
    %c0_i32_1 = arith.constant 0 : i32
    return %arg0, %c0_i32, %c0_i32_0 : i32, i32, i32
  }
  func.func @transform_2(%arg0: i32) -> (i32, i32) {
    %c0_i32 = arith.constant 0 : i32
    %c0_i32_0 = arith.constant 0 : i32
    %c0_i32_1 = arith.constant 0 : i32
    return %c0_i32, %c0_i32_0 : i32, i32
  }
  func.func @transform_3(%arg0: i32) -> (i32, i32) {
    %c0_i32 = arith.constant 0 : i32
    %c0_i32_0 = arith.constant 0 : i32
    %c0_i32_1 = arith.constant 0 : i32
    return %c0_i32, %c0_i32_0 : i32, i32
  }
  func.func @transform_4(%arg0: i32) -> (i32, i32) {
    %c0_i32 = arith.constant 0 : i32
    %c0_i32_0 = arith.constant 0 : i32
    %c0_i32_1 = arith.constant 0 : i32
    return %c0_i32, %c0_i32_0 : i32, i32
  }
  func.func @transform_5(%arg0: i32) -> (i32, i32, i32) {
    %c0_i32 = arith.constant 0 : i32
    %c0_i32_0 = arith.constant 0 : i32
    %c0_i32_1 = arith.constant 0 : i32
    return %arg0, %c0_i32, %c0_i32_0 : i32, i32, i32
  }
  func.func @transform_6(%arg0: i32) -> (i32, i32, i32) {
    %c0_i32 = arith.constant 0 : i32
    %c0_i32_0 = arith.constant 0 : i32
    %c0_i32_1 = arith.constant 0 : i32
    return %arg0, %c0_i32, %c0_i32_0 : i32, i32, i32
  }
}

</mosaic_0001>

<bundles_post_ra>
// kernel: tpu_custom_call.1
= control target key start
LH: loop header
LB: loop body
LE: loop exit
PB: predicated region body
PF: predicated region fallthrough
CT: control target
= control target key end

     0   :  { %vm31_vm0 = vcmask 130048   ;;  %vm65_vm1 = vcmask 261120   ;;  %s1872_s22 = smov 104   ;;  %s1873_s23 = smov 112   ;;  %s2615_s2 = inlined_call_operand.vmem [shape: f32[16,32], index: 2, kind: input, shape index: {}]   ;;  %s2616_s0 = inlined_call_operand.vmem [shape: f32[1,10,16], index: 0, kind: input, shape index: {}]   ;;  %s2617_s3 = inlined_call_operand.vmem [shape: f32[32,32], index: 3, kind: input, shape index: {}]   ;;  %s2618_s1 = inlined_call_operand.vmem [shape: f32[1,1,32], index: 1, kind: input, shape index: {}]   ;;  %s2619_s4 = inlined_call_operand.vmem [shape: f32[32,4], index: 4, kind: input, shape index: {}]   ;;  %s2620_s5 = inlined_call_operand.vmem [shape: f32[1,10,10], index: 5, kind: input, shape index: {}]   ;;  %s2621_s6 = inlined_call_operand.vmem [shape: f32[1,10,32], index: 6, kind: output, shape index: {}]  }
   0x1   :  { %v26_v0 = vld [vmem:[%s2615_s2 + $0x8] sm:$0xff]  ;;  %v25_v1 = vld [vmem:[%s2615_s2] sm:$0xff]  ;;  %v64_v3 = vld [vmem:[%s2617_s3 + $0x18] sm:$0xff]  ;;  %s1876_s24 = smov 16   ;;  %s1877_s25 = smov 24  }
   0x2   :  { %52 = vmatpush.msra.mxu0 %v26_v0  ;;  %v23_v2 = vld [vmem:[%s2616_s0] sm:$0xff]  ;;  %v63_v4 = vld [vmem:[%s2617_s3 + $0x10] sm:$0xff]  ;;  %84 = vmatpush.msra.mxu1 %v64_v3  ;;  %v24_v5 = vld [vmem:[%s2616_s0 + $0x8] sm:$0x3]  ;;  %s1878_s26 = smov 8  }
   0x3   :  { %v62_v6 = vld [vmem:[%s2617_s3 + $0x8] sm:$0xff]  ;;  %v61_v7 = vld [vmem:[%s2617_s3] sm:$0xff]  ;;  %v98_v20 = vld [vmem:[%s2619_s4 + $0x18] sm:$0xff] }
   0x4   :  { %53 = vmatpush.msra.mxu0 %v25_v1  ;;  %85 = vmatpush.msra.mxu1 %v63_v4  ;;  %v1829_v8 = vld [vmem:[%s2618_s1] ss:$0 sm:$0xff]  ;;  %v97_v22 = vld [vmem:[%s2619_s4 + $0x10] sm:$0xff]  ;;  %v96_v25 = vld [vmem:[%s2619_s4 + $0x8] sm:$0xff] }
   0x5   :  { %1782 = vmatmul.msk.f32.vlgmr.msra.gmra.mxu0 %vm31_vm0, %v23_v2  ;;  %1811 = vmatpush.msra.mxu2 %v98_v20  ;;  %v95_v31 = vld [vmem:[%s2619_s4] sm:$0xff] }
   0x6   :  { %86 = vmatpush.msra.mxu1 %v62_v6  ;;  %369 = vmatpush.msrb.mxu0 %v98_v20 }
   0x7   :  { %1812 = vmatpush.msra.mxu3 %v98_v20  ;;  %1813 = vmatpush.msra.mxu2 %v97_v22 }
   0x8   :  { %87 = vmatpush.msra.mxu1 %v61_v7  ;;  %370 = vmatpush.msrb.mxu0 %v97_v22 }
   0x9   :  { %1814 = vmatpush.msra.mxu3 %v97_v22  ;;  %1815 = vmatpush.msra.mxu2 %v96_v25 }
   0xa   :  { %371 = vmatpush.msrb.mxu0 %v96_v25 }
   0xb   :  { %1816 = vmatpush.msra.mxu3 %v96_v25  ;;  %1817 = vmatpush.msra.mxu2 %v95_v31 }
   0xc   :  { %372 = vmatpush.msrb.mxu0 %v95_v31 }
   0xd   :  { %1783 = vmatmul.msk.f32.gmra.mxu0 %vm31_vm0, %v24_v5  ;;  %1818 = vmatpush.msra.mxu3 %v95_v31 }
  0x82   :  { %v55_v9 = vpop.f32.mrf.mxu0 }
  0x83   :  { %v56_v10 = vadd.f32 %v1829_v8, %v55_v9 }
  0x85   :  { %1784 = vmatmul.msk.f32.vlgmr.msra.gmra.mxu1 %vm65_vm1, %v56_v10 }
  0x8a   :  { %v58_v11 = vpop.f32.mrf.mxu0 }
  0x8b   :  { %v59_v12 = vadd.f32 %v1829_v8, %v58_v11 }
  0x8d   :  { %1785 = vmatmul.msk.f32.gmra.mxu1 %vm65_vm1, %v59_v12 }
 0x102   :  { %v1945_v13 = vpop.f32.mrf.mxu1 }
 0x103   :  { %v103_v14 = vrot.slane %v1945_v13, 1  ;;  %v111_v15 = vperm.slane %v1945_v13, 0  ;;  %v104_v27 = vrot.slane %v1945_v13, 2  ;;  %v105_v37 = vrot.slane %v1945_v13, 3 }
 0x104   :  { %v106_v43 = vrot.slane %v1945_v13, 4  ;;  %v107_v57 = vrot.slane %v1945_v13, 5  ;;  %v108_v1 = vrot.slane %v1945_v13, 6  ;;  %v109_v20 = vrot.slane %v1945_v13, 7 }
 0x105   :  { %v112_v17 = vperm.slane %v103_v14, 0  ;;  %v131_v18 = vadd.f32 %v111_v15, %v1945_v13  ;;  %v113_v32 = vperm.slane %v104_v27, 0  ;;  %v114_v41 = vperm.slane %v105_v37, 0 }
 0x106   :  { %v115_v49 = vperm.slane %v106_v43, 0  ;;  %v116_v63 = vperm.slane %v107_v57, 0  ;;  %v117_v9 = vperm.slane %v108_v1, 0  ;;  %v118_v25 = vperm.slane %v109_v20, 0 }
 0x107   :  { %v133_v21 = vadd.f32 %v112_v17, %v1945_v13  ;;  %v171_v23 = vmul.f32 0.2, %v131_v18  ;;  %vm151_vm2 = vcmp.ge.f32.partialorder %v131_v18, 0.0  ;;  %v135_v38 = vadd.f32 %v113_v32, %v1945_v13 }
 0x108   :  { %v137_v46 = vadd.f32 %v114_v41, %v1945_v13  ;;  %v139_v58 = vadd.f32 %v115_v49, %v1945_v13  ;;  %v141_v6 = vadd.f32 %v116_v63, %v1945_v13 }
 0x109   :  { %v173_v26 = vmul.f32 0.2, %v133_v21  ;;  %vm153_vm4 = vcmp.ge.f32.partialorder %v133_v21, 0.0  ;;  %v191_v28 = vsel %vm151_vm2, %v131_v18, %v171_v23  ;;  %v175_v42 = vmul.f32 0.2, %v135_v38 }
 0x10a   :  { %v1949_v16 = vpop.f32.mrf.mxu1  ;;  %261 = vst [vmem:[#allocation1] ss:$4 sm:$0xff] %v191_v28  ;;  %v231_v33 = vrot.slane %v191_v28, 2  ;;  %v232_v34 = vrot.slane %v191_v28, 4  ;;  %v233_v35 = vrot.slane %v191_v28, 6  ;;  %vm155_vm5 = vcmp.ge.f32.partialorder %v135_v38, 0.0 }
 0x10b   :  { %v132_v19 = vadd.f32 %v111_v15, %v1949_v16  ;;  %v193_v30 = vsel %vm153_vm4, %v133_v21, %v173_v26  ;;  %v134_v40 = vadd.f32 %v112_v17, %v1949_v16  ;;  %v136_v44 = vadd.f32 %v113_v32, %v1949_v16 }
 0x10c   :  { %271 = vst [vmem:[#allocation1 + $0x21] ss:$4 sm:$0xff] %v193_v30  ;;  %v234_v36 = vrot.slane %v193_v30, 2  ;;  %v235_v39 = vrot.slane %v193_v30, 4  ;;  %v195_v47 = vsel %vm155_vm5, %v135_v38, %v175_v42  ;;  %v236_v48 = vrot.slane %v193_v30, 6 }
 0x10d   :  { %v172_v24 = vmul.f32 0.2, %v132_v19  ;;  %vm152_vm3 = vcmp.ge.f32.partialorder %v132_v19, 0.0  ;;  %263 = vst [vmem:[#allocation1 + $0x1] ss:$4 sm:$0xff] %v231_v33  ;;  %vm154_vm6 = vcmp.ge.f32.partialorder %v134_v40, 0.0  ;;  %v138_v60 = vadd.f32 %v114_v41, %v1949_v16 }
 0x10e   :  { %265 = vst [vmem:[#allocation1 + $0x2] ss:$4 sm:$0xff] %v232_v34  ;;  %v174_v45 = vmul.f32 0.2, %v134_v40  ;;  %v176_v51 = vmul.f32 0.2, %v136_v44  ;;  %v140_v10 = vadd.f32 %v115_v49, %v1949_v16  ;;  %v143_v18 = vadd.f32 %v117_v9, %v1945_v13 }
 0x10f   :  { %v192_v29 = vsel %vm152_vm3, %v132_v19, %v172_v24  ;;  %267 = vst [vmem:[#allocation1 + $0x3] ss:$4 sm:$0xff] %v233_v35  ;;  %v237_v53 = vrot.slane %v195_v47, 2  ;;  %vm156_vm7 = vcmp.ge.f32.partialorder %v136_v44, 0.0  ;;  %v177_v55 = vmul.f32 0.2, %v137_v46 }
 0x110   :  { %269 = vst [vmem:[#allocation1 + $0x20] ss:$4 sm:$0xff] %v192_v29  ;;  %v194_v52 = vsel %vm154_vm6, %v134_v40, %v174_v45  ;;  %v238_v56 = vrot.slane %v195_v47, 4  ;;  %vm157_vm8 = vcmp.ge.f32.partialorder %v137_v46, 0.0  ;;  %v239_v59 = vrot.slane %v195_v47, 6 }
 0x111   :  { %273 = vst [vmem:[#allocation1 + $0x22] ss:$4 sm:$0xff] %v234_v36  ;;  %v196_v61 = vsel %vm156_vm7, %v136_v44, %v176_v51  ;;  %v197_v62 = vsel %vm157_vm8, %v137_v46, %v177_v55  ;;  %v179_v0 = vmul.f32 0.2, %v139_v58  ;;  %vm159_vm9 = vcmp.ge.f32.partialorder %v139_v58, 0.0 }
 0x112   :  { %275 = vst [vmem:[#allocation1 + $0x23] ss:$4 sm:$0xff] %v235_v39  ;;  %v178_v2 = vmul.f32 0.2, %v138_v60  ;;  %v240_v3 = vrot.slane %v197_v62, 2  ;;  %vm158_vm10 = vcmp.ge.f32.partialorder %v138_v60, 0.0  ;;  %v142_v22 = vadd.f32 %v116_v63, %v1949_v16 }
 0x113   :  { %v241_v4 = vrot.slane %v197_v62, 4  ;;  %v199_v7 = vsel %vm159_vm9, %v139_v58, %v179_v0  ;;  %v242_v8 = vrot.slane %v197_v62, 6  ;;  %v181_v15 = vmul.f32 0.2, %v141_v6 }
 0x114   :  { %v198_v11 = vsel %vm158_vm10, %v138_v60, %v178_v2  ;;  %v243_v12 = vrot.slane %v199_v7, 2  ;;  %v244_v17 = vrot.slane %v199_v7, 4  ;;  %vm161_vm11 = vcmp.ge.f32.partialorder %v141_v6, 0.0 }
 0x115   :  { %v245_v19 = vrot.slane %v199_v7, 6  ;;  %v180_v21 = vmul.f32 0.2, %v140_v10  ;;  %vm160_vm12 = vcmp.ge.f32.partialorder %v140_v10, 0.0  ;;  %v201_v23 = vsel %vm161_vm11, %v141_v6, %v181_v15 }
 0x116   :  { %v276_v50 = vld.sshfl [vmem:[#allocation1] sm:$0xff pattern:$0x73625140]  ;;  %v183_v24 = vmul.f32 0.2, %v143_v18  ;;  %vm163_vm13 = vcmp.ge.f32.partialorder %v143_v18, 0.0  ;;  %v145_v33 = vadd.f32 %v118_v25, %v1945_v13  ;;  %v144_v35 = vadd.f32 %v117_v9, %v1949_v16 }
 0x117   :  { %278 = vst [vmem:[#allocation1] ss:$4 sm:$0xff] %v236_v48  ;;  %1786 = vmatmul.msk.f32.vlgmr.msrb.gmra.mxu0 %vm65_vm1, %v276_v50  ;;  %v200_v26 = vsel %vm160_vm12, %v140_v10, %v180_v21  ;;  %v182_v28 = vmul.f32 0.2, %v142_v22  ;;  %v246_v29 = vrot.slane %v201_v23, 2  ;;  %vm162_vm14 = vcmp.ge.f32.partialorder %v142_v22, 0.0 }
 0x118   :  { %279 = vst [vmem:[#allocation1 + $0x1] ss:$4 sm:$0xff] %v194_v52  ;;  %v247_v30 = vrot.slane %v201_v23, 4  ;;  %v203_v31 = vsel %vm163_vm13, %v143_v18, %v183_v24  ;;  %v248_v32 = vrot.slane %v201_v23, 6  ;;  %v119_v37 = vperm.slane %v1949_v16, 0 }
 0x119   :  { %v277_v54 = vld.sshfl [vmem:[#allocation1 + $0x20] sm:$0xff pattern:$0x73625140]  ;;  %280 = vst [vmem:[#allocation1 + $0x2] ss:$4 sm:$0xff] %v195_v47  ;;  %v202_v36 = vsel %vm162_vm14, %v142_v22, %v182_v28  ;;  %v249_v38 = vrot.slane %v203_v31, 2  ;;  %v146_v39 = vadd.f32 %v118_v25, %v1949_v16 }
 0x11a   :  { %281 = vst [vmem:[#allocation1 + $0x3] ss:$4 sm:$0xff] %v237_v53  ;;  %v110_v40 = vrot.slane %v1949_v16, 1  ;;  %v185_v41 = vmul.f32 0.2, %v145_v33  ;;  %vm165_vm15 = vcmp.ge.f32.partialorder %v145_v33, 0.0  ;;  %v147_v44 = vadd.f32 %v119_v37, %v1945_v13 }
 0x11b   :  { %282 = vst [vmem:[#allocation1 + $0x20] ss:$4 sm:$0xff] %v238_v56  ;;  %v184_v42 = vmul.f32 0.2, %v144_v35  ;;  %vm164_vm2 = vcmp.ge.f32.partialorder %v144_v35, 0.0  ;;  %v250_v45 = vrot.slane %v203_v31, 4 }
 0x11c   :  { %283 = vst [vmem:[#allocation1 + $0x21] ss:$4 sm:$0xff] %v239_v59  ;;  %v186_v46 = vmul.f32 0.2, %v146_v39  ;;  %v251_v47 = vrot.slane %v203_v31, 6  ;;  %v120_v49 = vperm.slane %v110_v40, 0  ;;  %v205_v50 = vsel %vm165_vm15, %v145_v33, %v185_v41 }
 0x11d   :  { %284 = vst [vmem:[#allocation1 + $0x22] ss:$4 sm:$0xff] %v196_v61  ;;  %vm166_vm3 = vcmp.ge.f32.partialorder %v146_v39, 0.0  ;;  %v204_v51 = vsel %vm164_vm2, %v144_v35, %v184_v42  ;;  %v187_v52 = vmul.f32 0.2, %v147_v44  ;;  %vm167_vm4 = vcmp.ge.f32.partialorder %v147_v44, 0.0 }
 0x11e   :  { %285 = vst [vmem:[#allocation1 + $0x23] ss:$4 sm:$0xff] %v197_v62  ;;  %v206_v53 = vsel %vm166_vm3, %v146_v39, %v186_v46  ;;  %v149_v56 = vadd.f32 %v120_v49, %v1945_v13  ;;  %v253_v57 = vrot.slane %v205_v50, 4  ;;  %v254_v58 = vrot.slane %v205_v50, 6 }
 0x11f   :  { %1787 = vmatmul.msk.f32.gmra.mxu0 %vm65_vm1, %v277_v54  ;;  %v252_v54 = vrot.slane %v205_v50, 2  ;;  %v148_v59 = vadd.f32 %v119_v37, %v1949_v16  ;;  %v207_v60 = vsel %vm167_vm4, %v147_v44, %v187_v52  ;;  %vm945_vm10 = vcmask 76800  }
 0x120   :  { %v189_v61 = vmul.f32 0.2, %v149_v56  ;;  %vm169_vm5 = vcmp.ge.f32.partialorder %v149_v56, 0.0  ;;  %v255_v63 = vrot.slane %v207_v60, 2  ;;  %v256_v1 = vrot.slane %v207_v60, 4 }
 0x121   :  { %v286_v5 = vld.sshfl [vmem:[#allocation1] sm:$0xff pattern:$0x73625140]  ;;  %v188_v62 = vmul.f32 0.2, %v148_v59  ;;  %vm168_vm6 = vcmp.ge.f32.partialorder %v148_v59, 0.0 }
 0x122   :  { %288 = vst [vmem:[#allocation1] ss:$4 sm:$0xff] %v240_v3  ;;  %v257_v2 = vrot.slane %v207_v60, 6  ;;  %v209_v3 = vsel %vm169_vm5, %v149_v56, %v189_v61 }
 0x123   :  { %289 = vst [vmem:[#allocation1 + $0x1] ss:$4 sm:$0xff] %v241_v4  ;;  %v150_v4 = vadd.f32 %v120_v49, %v1949_v16  ;;  %v208_v6 = vsel %vm168_vm6, %v148_v59, %v188_v62 }
 0x124   :  { %290 = vst [vmem:[#allocation1 + $0x2] ss:$4 sm:$0xff] %v242_v8  ;;  %v259_v8 = vrot.slane %v209_v3, 4 }
 0x125   :  { %v287_v14 = vld.sshfl [vmem:[#allocation1 + $0x20] sm:$0xff pattern:$0x73625140]  ;;  %291 = vst [vmem:[#allocation1 + $0x3] ss:$4 sm:$0xff] %v198_v11  ;;  %vm170_vm7 = vcmp.ge.f32.partialorder %v150_v4, 0.0 }
 0x126   :  { %292 = vst [vmem:[#allocation1 + $0x20] ss:$4 sm:$0xff] %v199_v7  ;;  %1789 = vmatmul.msk.f32.vlgmr.msra.gmra.mxu2 %vm65_vm1, %v287_v14  ;;  %v258_v7 = vrot.slane %v209_v3, 2  ;;  %v190_v9 = vmul.f32 0.2, %v150_v4 }
 0x127   :  { %293 = vst [vmem:[#allocation1 + $0x21] ss:$4 sm:$0xff] %v243_v12  ;;  %1788 = vmatmul.msk.f32.gmra.mxu0 %vm65_vm1, %v286_v5  ;;  %v260_v12 = vrot.slane %v209_v3, 6 }
 0x128   :  { %294 = vst [vmem:[#allocation1 + $0x22] ss:$4 sm:$0xff] %v244_v17  ;;  %v210_v10 = vsel %vm170_vm7, %v150_v4, %v190_v9 }
 0x129   :  { %295 = vst [vmem:[#allocation1 + $0x23] ss:$4 sm:$0xff] %v245_v19 }
 0x12c   :  { %v296_v27 = vld.sshfl [vmem:[#allocation1] sm:$0xff pattern:$0x73625140] }
 0x12d   :  { %298 = vst [vmem:[#allocation1] ss:$4 sm:$0xff] %v200_v26 }
 0x12e   :  { %299 = vst [vmem:[#allocation1 + $0x1] ss:$4 sm:$0xff] %v201_v23  ;;  %1790 = vmatmul.msk.f32.gmra.mxu2 %vm65_vm1, %v296_v27 }
 0x12f   :  { %300 = vst [vmem:[#allocation1 + $0x2] ss:$4 sm:$0xff] %v246_v29 }
 0x130   :  { %v297_v34 = vld.sshfl [vmem:[#allocation1 + $0x20] sm:$0xff pattern:$0x73625140]  ;;  %301 = vst [vmem:[#allocation1 + $0x3] ss:$4 sm:$0xff] %v247_v30 }
 0x131   :  { %302 = vst [vmem:[#allocation1 + $0x20] ss:$4 sm:$0xff] %v248_v32 }
 0x132   :  { %303 = vst [vmem:[#allocation1 + $0x21] ss:$4 sm:$0xff] %v202_v36 }
 0x133   :  { %304 = vst [vmem:[#allocation1 + $0x22] ss:$4 sm:$0xff] %v203_v31 }
 0x134   :  { %305 = vst [vmem:[#allocation1 + $0x23] ss:$4 sm:$0xff] %v249_v38 }
 0x136   :  { %1791 = vmatmul.msk.f32.gmra.mxu2 %vm65_vm1, %v297_v34 }
 0x137   :  { %v306_v48 = vld.sshfl [vmem:[#allocation1] sm:$0xff pattern:$0x73625140] }
 0x138   :  { %308 = vst [vmem:[#allocation1] ss:$4 sm:$0xff] %v250_v45 }
 0x139   :  { %309 = vst [vmem:[#allocation1 + $0x1] ss:$4 sm:$0xff] %v251_v47 }
 0x13a   :  { %310 = vst [vmem:[#allocation1 + $0x2] ss:$4 sm:$0xff] %v204_v51 }
 0x13b   :  { %v307_v55 = vld.sshfl [vmem:[#allocation1 + $0x20] sm:$0xff pattern:$0x73625140]  ;;  %311 = vst [vmem:[#allocation1 + $0x3] ss:$4 sm:$0xff] %v205_v50 }
 0x13c   :  { %315 = vst [vmem:[#allocation1 + $0x23] ss:$4 sm:$0xff] %v206_v53 }
 0x13d   :  { %312 = vst [vmem:[#allocation1 + $0x20] ss:$4 sm:$0xff] %v252_v54 }
 0x13e   :  { %313 = vst [vmem:[#allocation1 + $0x21] ss:$4 sm:$0xff] %v253_v57  ;;  %1792 = vmatmul.msk.f32.gmra.mxu2 %vm65_vm1, %v306_v48 }
 0x13f   :  { %314 = vst [vmem:[#allocation1 + $0x22] ss:$4 sm:$0xff] %v254_v58 }
 0x142   :  { %v316_v0 = vld.sshfl [vmem:[#allocation1] sm:$0xff pattern:$0x73625140] }
 0x143   :  { %318 = vst [vmem:[#allocation1] ss:$4 sm:$0xff] %v207_v60 }
 0x144   :  { %319 = vst [vmem:[#allocation1 + $0x1] ss:$4 sm:$0xff] %v255_v63 }
 0x145   :  { %320 = vst [vmem:[#allocation1 + $0x2] ss:$4 sm:$0xff] %v256_v1 }
 0x146   :  { %321 = vst [vmem:[#allocation1 + $0x3] ss:$4 sm:$0xff] %v257_v2  ;;  %v317_v5 = vld.sshfl [vmem:[#allocation1 + $0x20] sm:$0xff pattern:$0x73625140]  ;;  %1793 = vmatmul.msk.f32.gmra.mxu2 %vm65_vm1, %v307_v55 }
 0x147   :  { %1795 = vmatmul.msk.f32.vlgmr.msra.gmra.mxu3 %vm65_vm1, %v317_v5  ;;  %322 = vst [vmem:[#allocation1 + $0x20] ss:$4 sm:$0xff] %v208_v6 }
 0x148   :  { %323 = vst [vmem:[#allocation1 + $0x21] ss:$4 sm:$0xff] %v209_v3 }
 0x149   :  { %324 = vst [vmem:[#allocation1 + $0x22] ss:$4 sm:$0xff] %v258_v7 }
 0x14a   :  { %325 = vst [vmem:[#allocation1 + $0x23] ss:$4 sm:$0xff] %v259_v8 }
 0x14d   :  { %v326_v11 = vld.sshfl [vmem:[#allocation1] sm:$0xff pattern:$0x73625140] }
 0x14e   :  { %329 = vst [vmem:[#allocation1 + $0x1] ss:$4 sm:$0xff] %v210_v10  ;;  %1794 = vmatmul.msk.f32.gmra.mxu2 %vm65_vm1, %v316_v0 }
 0x14f   :  { %1796 = vmatmul.msk.f32.gmra.mxu3 %vm65_vm1, %v326_v11  ;;  %328 = vst [vmem:[#allocation1] ss:$4 sm:$0xff] %v260_v12 }
 0x151   :  { %v327_v14 = vld.sshfl [vmem:[#allocation1 + $0x20] sm:$0xff pattern:$0x73625140] }
 0x156   :  { %v330_v15 = vld.sshfl [vmem:[#allocation1] sm:$0xff pattern:$0x73625140] }
 0x157   :  { %1797 = vmatmul.msk.f32.gmra.mxu3 %vm65_vm1, %v327_v14 }
 0x15f   :  { %1798 = vmatmul.msk.f32.gmra.mxu3 %vm65_vm1, %v330_v15 }
 0x194   :  { %v374_v17 = vpop.f32.mrf.mxu0 }
 0x195   :  { %v426_v18 = vrot.slane %v374_v17, 2  ;;  %v427_v19 = vrot.slane %v374_v17, 4  ;;  %v428_v20 = vrot.slane %v374_v17, 6  ;;  %463 = vst [vmem:[#allocation1] ss:$4 sm:$0xff] %v374_v17 }
 0x197   :  { %465 = vst [vmem:[#allocation1 + $0x1] ss:$4 sm:$0xff] %v426_v18 }
 0x198   :  { %467 = vst [vmem:[#allocation1 + $0x2] ss:$4 sm:$0xff] %v427_v19 }
 0x199   :  { %469 = vst [vmem:[#allocation1 + $0x3] ss:$4 sm:$0xff] %v428_v20 }
 0x19c   :  { %v377_v21 = vpop.f32.mrf.mxu0 }
 0x19d   :  { %v429_v22 = vrot.slane %v377_v21, 2  ;;  %471 = vst [vmem:[#allocation1 + $0x20] ss:$4 sm:$0xff] %v377_v21  ;;  %v430_v23 = vrot.slane %v377_v21, 4  ;;  %v431_v24 = vrot.slane %v377_v21, 6 }
 0x1a0   :  { %v472_v25 = vld.sshfl [vmem:[#allocation1] sm:$0xff pattern:$0x73625140] }
 0x1a1   :  { %474 = vst [vmem:[#allocation1] ss:$4 sm:$0xff] %v429_v22  ;;  %557 = vxpose.xlu1.b32.start [1/2] (short) (narrow) %v472_v25, 8  ;;  %v1870_v25 = vmov 0  }
 0x1a2   :  { %475 = vst [vmem:[#allocation1 + $0x1] ss:$4 sm:$0xff] %v430_v23 }
 0x1a3   :  { %476 = vst [vmem:[#allocation1 + $0x2] ss:$4 sm:$0xff] %v431_v24  ;;  %v2009_v24 = vld [vmem:[%s2620_s5] sm:$0xff] }
 0x1a4   :  { %v380_v26 = vpop.f32.mrf.mxu0  ;;  %v473_v28 = vld.sshfl [vmem:[#allocation1 + $0x20] sm:$0xff pattern:$0x73625140]  ;;  %vm895_vm8 = vcmp.ne.f32.partialorder %v2009_v24, 0.0 }
 0x1a5   :  { %v432_v27 = vrot.slane %v380_v26, 2  ;;  %477 = vst [vmem:[#allocation1 + $0x3] ss:$4 sm:$0xff] %v380_v26  ;;  %v433_v30 = vrot.slane %v380_v26, 4  ;;  %v434_v31 = vrot.slane %v380_v26, 6  ;;  %v905_v26 = vsel %vm895_vm8, 1, %v1870_v25 }
 0x1a7   :  { %478 = vst [vmem:[#allocation1 + $0x20] ss:$4 sm:$0xff] %v432_v27  ;;  %v915_v27 = vperm.slane %v905_v26, 0 }
 0x1a9   :  { %v383_v29 = vpop.f32.mrf.mxu2  ;;  %558 = vxpose.xlu1.b32.end [2/2] (short) (narrow) %v473_v28, 8  ;;  %vm2013_vm9 = vcmp.eq.s32.totalorder %v915_v27, 1 }
 0x1aa   :  { %v435_v33 = vrot.slane %v383_v29, 2  ;;  %v436_v35 = vrot.slane %v383_v29, 4  ;;  %v437_v37 = vrot.slane %v383_v29, 6 }
 0x1ac   :  { %v479_v32 = vld.sshfl [vmem:[#allocation1] sm:$0xff pattern:$0x73625140] }
 0x1ad   :  { %481 = vst [vmem:[#allocation1] ss:$4 sm:$0xff] %v433_v30  ;;  %v879_v30 = vrot.slane %v2009_v24, 1 }
 0x1ae   :  { %482 = vst [vmem:[#allocation1 + $0x1] ss:$4 sm:$0xff] %v434_v31  ;;  %v480_v34 = vld.sshfl [vmem:[#allocation1 + $0x20] sm:$0xff pattern:$0x73625140] }
 0x1af   :  { %483 = vst [vmem:[#allocation1 + $0x2] ss:$4 sm:$0xff] %v383_v29  ;;  %vm896_vm11 = vcmp.ne.f32.partialorder %v879_v30, 0.0 }
 0x1b0   :  { %484 = vst [vmem:[#allocation1 + $0x3] ss:$4 sm:$0xff] %v435_v33  ;;  %v880_v33 = vrot.slane %v2009_v24, 2 }
 0x1b1   :  { %v386_v36 = vpop.f32.mrf.mxu2  ;;  %589 = vxpose.xlu1.b32.start [1/2] (short) (narrow) %v479_v32, 8  ;;  %485 = vst [vmem:[#allocation1 + $0x20] ss:$4 sm:$0xff] %v436_v35 }
 0x1b2   :  { %v438_v39 = vrot.slane %v386_v36, 2  ;;  %v439_v40 = vrot.slane %v386_v36, 4  ;;  %v440_v44 = vrot.slane %v386_v36, 6  ;;  %vm897_vm12 = vcmp.ne.f32.partialorder %v880_v33, 0.0 }
 0x1b7   :  { %v486_v38 = vld.sshfl [vmem:[#allocation1] sm:$0xff pattern:$0x73625140] }
 0x1b8   :  { %488 = vst [vmem:[#allocation1] ss:$4 sm:$0xff] %v437_v37  ;;  %621 = vxpose.xlu2.b32.start [1/2] (short) (narrow) %v486_v38, 8  ;;  %v487_v42 = vld.sshfl [vmem:[#allocation1 + $0x20] sm:$0xff pattern:$0x73625140] }
 0x1b9   :  { %489 = vst [vmem:[#allocation1 + $0x1] ss:$4 sm:$0xff] %v386_v36  ;;  %v389_v41 = vpop.f32.mrf.mxu2  ;;  %590 = vxpose.xlu1.b32.end [2/2] (short) (narrow) %v480_v34, 8  ;;  %v906_v34 = vsel %vm896_vm11, 1, %v1870_v25  ;;  %v907_v36 = vsel %vm897_vm12, 1, %v1870_v25 }
 0x1ba   :  { %490 = vst [vmem:[#allocation1 + $0x2] ss:$4 sm:$0xff] %v438_v39  ;;  %v441_v47 = vrot.slane %v389_v41, 2  ;;  %v442_v48 = vrot.slane %v389_v41, 4  ;;  %v443_v49 = vrot.slane %v389_v41, 6  ;;  %v916_v35 = vperm.slane %v906_v34, 0 }
 0x1bb   :  { %491 = vst [vmem:[#allocation1 + $0x3] ss:$4 sm:$0xff] %v439_v40  ;;  %v917_v38 = vperm.slane %v907_v36, 0 }
 0x1bc   :  { %492 = vst [vmem:[#allocation1 + $0x20] ss:$4 sm:$0xff] %v440_v44  ;;  %vm2027_vm13 = vcmp.eq.s32.totalorder %v916_v35, 1 }
 0x1bd   :  { %vm2037_vm14 = vcmp.eq.s32.totalorder %v917_v38, 1 }
 0x1c0   :  { %622 = vxpose.xlu2.b32.end [2/2] (short) (narrow) %v487_v42, 8 }
 0x1c1   :  { %v392_v45 = vpop.f32.mrf.mxu2 }
 0x1c2   :  { %v493_v46 = vld.sshfl [vmem:[#allocation1] sm:$0xff pattern:$0x73625140]  ;;  %v444_v52 = vrot.slane %v392_v45, 2  ;;  %v445_v54 = vrot.slane %v392_v45, 4  ;;  %v446_v55 = vrot.slane %v392_v45, 6 }
 0x1c3   :  { %495 = vst [vmem:[#allocation1] ss:$4 sm:$0xff] %v389_v41  ;;  %653 = vxpose.xlu1.b32.start [1/2] (short) (narrow) %v493_v46, 8  ;;  %v494_v50 = vld.sshfl [vmem:[#allocation1 + $0x20] sm:$0xff pattern:$0x73625140] }
 0x1c4   :  { %496 = vst [vmem:[#allocation1 + $0x1] ss:$4 sm:$0xff] %v441_v47 }
 0x1c5   :  { %497 = vst [vmem:[#allocation1 + $0x2] ss:$4 sm:$0xff] %v442_v48 }
 0x1c6   :  { %498 = vst [vmem:[#allocation1 + $0x3] ss:$4 sm:$0xff] %v443_v49 }
 0x1c7   :  { %499 = vst [vmem:[#allocation1 + $0x20] ss:$4 sm:$0xff] %v392_v45  ;;  %v881_v45 = vrot.slane %v2009_v24, 3 }
 0x1c9   :  { %v395_v51 = vpop.f32.mrf.mxu2  ;;  %vm898_vm15 = vcmp.ne.f32.partialorder %v881_v45, 0.0 }
 0x1ca   :  { %v447_v56 = vrot.slane %v395_v51, 2  ;;  %v448_v59 = vrot.slane %v395_v51, 4  ;;  %v449_v60 = vrot.slane %v395_v51, 6  ;;  %v401_v1 = vpop.f32.mrf.mxu3  ;;  %v908_v48 = vsel %vm898_vm15, 1, %v1870_v25 }
 0x1cb   :  { %654 = vxpose.xlu1.b32.end [2/2] (short) (narrow) %v494_v50, 8  ;;  %v453_v4 = vrot.slane %v401_v1, 2  ;;  %v454_v5 = vrot.slane %v401_v1, 4  ;;  %v455_v8 = vrot.slane %v401_v1, 6  ;;  %v918_v49 = vperm.slane %v908_v48, 0 }
 0x1cd   :  { %v500_v53 = vld.sshfl [vmem:[#allocation1] sm:$0xff pattern:$0x73625140]  ;;  %vm2046_vm2 = vcmp.eq.s32.totalorder %v918_v49, 1 }
 0x1ce   :  { %502 = vst [vmem:[#allocation1] ss:$4 sm:$0xff] %v444_v52  ;;  %685 = vxpose.xlu0.b32.start [1/2] (short) (narrow) %v500_v53, 8  ;;  %v501_v57 = vld.sshfl [vmem:[#allocation1 + $0x20] sm:$0xff pattern:$0x73625140] }
 0x1cf   :  { %503 = vst [vmem:[#allocation1 + $0x1] ss:$4 sm:$0xff] %v445_v54 }
 0x1d0   :  { %504 = vst [vmem:[#allocation1 + $0x2] ss:$4 sm:$0xff] %v446_v55 }
 0x1d1   :  { %505 = vst [vmem:[#allocation1 + $0x3] ss:$4 sm:$0xff] %v395_v51  ;;  %v398_v58 = vpop.f32.mrf.mxu2  ;;  %v883_v51 = vrot.slane %v2009_v24, 5 }
 0x1d2   :  { %506 = vst [vmem:[#allocation1 + $0x20] ss:$4 sm:$0xff] %v447_v56  ;;  %v450_v62 = vrot.slane %v398_v58, 2  ;;  %v451_v63 = vrot.slane %v398_v58, 4  ;;  %v452_v2 = vrot.slane %v398_v58, 6  ;;  %v404_v6 = vpop.f32.mrf.mxu3 }
 0x1d3   :  { %v456_v9 = vrot.slane %v404_v6, 2  ;;  %v457_v11 = vrot.slane %v404_v6, 4  ;;  %v458_v14 = vrot.slane %v404_v6, 6  ;;  %vm900_vm3 = vcmp.ne.f32.partialorder %v883_v51, 0.0 }
 0x1d4   :  { %v910_v55 = vsel %vm900_vm3, 1, %v1870_v25 }
 0x1d5   :  { %v920_v56 = vperm.slane %v910_v55, 0 }
 0x1d6   :  { %686 = vxpose.xlu0.b32.end [2/2] (short) (narrow) %v501_v57, 8 }
 0x1d7   :  { %vm2058_vm4 = vcmp.eq.s32.totalorder %v920_v56, 1 }
 0x1d8   :  { %v507_v61 = vld.sshfl [vmem:[#allocation1] sm:$0xff pattern:$0x73625140] }
 0x1d9   :  { %509 = vst [vmem:[#allocation1] ss:$4 sm:$0xff] %v448_v59  ;;  %717 = vxpose.xlu2.b32.start [1/2] (short) (narrow) %v507_v61, 8  ;;  %v508_v0 = vld.sshfl [vmem:[#allocation1 + $0x20] sm:$0xff pattern:$0x73625140] }
 0x1da   :  { %510 = vst [vmem:[#allocation1 + $0x1] ss:$4 sm:$0xff] %v449_v60  ;;  %v407_v12 = vpop.f32.mrf.mxu3 }
 0x1db   :  { %511 = vst [vmem:[#allocation1 + $0x2] ss:$4 sm:$0xff] %v398_v58  ;;  %v459_v17 = vrot.slane %v407_v12, 2  ;;  %v460_v18 = vrot.slane %v407_v12, 4  ;;  %v461_v21 = vrot.slane %v407_v12, 6 }
 0x1dc   :  { %512 = vst [vmem:[#allocation1 + $0x3] ss:$4 sm:$0xff] %v450_v62 }
 0x1dd   :  { %513 = vst [vmem:[#allocation1 + $0x20] ss:$4 sm:$0xff] %v451_v63 }
 0x1e1   :  { %718 = vxpose.xlu2.b32.end [2/2] (short) (narrow) %v508_v0, 8  ;;  %v884_v0 = vrot.slane %v2009_v24, 6 }
 0x1e2   :  { %v410_v19 = vpop.f32.mrf.mxu3 }
 0x1e3   :  { %v514_v3 = vld.sshfl [vmem:[#allocation1] sm:$0xff pattern:$0x73625140]  ;;  %v462_v23 = vrot.slane %v410_v19, 2  ;;  %vm901_vm5 = vcmp.ne.f32.partialorder %v884_v0, 0.0 }
 0x1e4   :  { %749 = vxpose.xlu0.b32.start [1/2] (short) (narrow) %v514_v3, 8  ;;  %516 = vst [vmem:[#allocation1] ss:$4 sm:$0xff] %v452_v2  ;;  %v515_v7 = vld.sshfl [vmem:[#allocation1 + $0x20] sm:$0xff pattern:$0x73625140] }
 0x1e5   :  { %517 = vst [vmem:[#allocation1 + $0x1] ss:$4 sm:$0xff] %v401_v1  ;;  %v911_v1 = vsel %vm901_vm5, 1, %v1870_v25 }
 0x1e6   :  { %518 = vst [vmem:[#allocation1 + $0x2] ss:$4 sm:$0xff] %v453_v4  ;;  %v921_v2 = vperm.slane %v911_v1, 0 }
 0x1e7   :  { %519 = vst [vmem:[#allocation1 + $0x3] ss:$4 sm:$0xff] %v454_v5 }
 0x1e8   :  { %520 = vst [vmem:[#allocation1 + $0x20] ss:$4 sm:$0xff] %v455_v8  ;;  %vm2067_vm6 = vcmp.eq.s32.totalorder %v921_v2, 1 }
 0x1ec   :  { %750 = vxpose.xlu0.b32.end [2/2] (short) (narrow) %v515_v7, 8  ;;  %v885_v7 = vrot.slane %v2009_v24, 7 }
 0x1ee   :  { %v521_v10 = vld.sshfl [vmem:[#allocation1] sm:$0xff pattern:$0x73625140]  ;;  %vm902_vm7 = vcmp.ne.f32.partialorder %v885_v7, 0.0 }
 0x1ef   :  { %523 = vst [vmem:[#allocation1] ss:$4 sm:$0xff] %v404_v6  ;;  %v522_v15 = vld.sshfl [vmem:[#allocation1 + $0x20] sm:$0xff pattern:$0x73625140] }
 0x1f0   :  { %524 = vst [vmem:[#allocation1 + $0x1] ss:$4 sm:$0xff] %v456_v9  ;;  %v912_v9 = vsel %vm902_vm7, 1, %v1870_v25 }
 0x1f1   :  { %525 = vst [vmem:[#allocation1 + $0x2] ss:$4 sm:$0xff] %v457_v11 }
 0x1f2   :  { %526 = vst [vmem:[#allocation1 + $0x3] ss:$4 sm:$0xff] %v458_v14 }
 0x1f3   :  { %527 = vst [vmem:[#allocation1 + $0x20] ss:$4 sm:$0xff] %v407_v12 }
 0x1f4   :  { %781 = vxpose.xlu0.b32.start [1/2] (short) (narrow) %v521_v10, 8  ;;  %v922_v10 = vperm.slane %v912_v9, 0 }
 0x1f6   :  { %vm2079_vm8 = vcmp.eq.s32.totalorder %v922_v10, 1 }
 0x1f9   :  { %v528_v20 = vld.sshfl [vmem:[#allocation1] sm:$0xff pattern:$0x73625140] }
 0x1fa   :  { %530 = vst [vmem:[#allocation1] ss:$4 sm:$0xff] %v459_v17  ;;  %v529_v22 = vld.sshfl [vmem:[#allocation1 + $0x20] sm:$0xff pattern:$0x73625140] }
 0x1fb   :  { %531 = vst [vmem:[#allocation1 + $0x1] ss:$4 sm:$0xff] %v460_v18 }
 0x1fc   :  { %782 = vxpose.xlu0.b32.end [2/2] (short) (narrow) %v522_v15, 8  ;;  %532 = vst [vmem:[#allocation1 + $0x2] ss:$4 sm:$0xff] %v461_v21  ;;  %v100_v15 = vld [vmem:[%s2620_s5 + $0x8] sm:$0x3]  ;;  %s1871_s5 = smov 120  }
 0x1fd   :  { %533 = vst [vmem:[#allocation1 + $0x3] ss:$4 sm:$0xff] %v410_v19  ;;  %vm903_vm11 = vcmp.ne.f32.partialorder %v100_v15, 0.0  ;;  %v886_v49 = vrot.slane %v100_v15, 1 }
 0x1fe   :  { %534 = vst [vmem:[#allocation1 + $0x20] ss:$4 sm:$0xff] %v462_v23  ;;  %v913_v17 = vsel %vm903_vm11, 1, %v1870_v25 }
 0x1ff   :  { %v923_v18 = vperm.slane %v913_v17, 0  ;;  %vm904_vm3 = vcmp.ne.f32.partialorder %v886_v49, 0.0 }
 0x201   :  { %vm2093_vm12 = vcmp.eq.s32.totalorder %v923_v18, 1 }
 0x204   :  { %813 = vxpose.xlu0.b32.start [1/2] (short) (narrow) %v528_v20, 8  ;;  %v535_v61 = vld.sshfl [vmem:[#allocation1] sm:$0xff pattern:$0x73625140] }
 0x205   :  { %v536_v62 = vld.sshfl [vmem:[#allocation1 + $0x20] sm:$0xff pattern:$0x73625140] }
 0x20c   :  { %814 = vxpose.xlu0.b32.end [2/2] (short) (narrow) %v529_v22, 8 }
 0x245   :  { %v573_v29 = vpop.trf.xlu1 }
 0x246   :  { %v2020_v31 = vsel %vm2013_vm9, %v573_v29, -1e+30 }
 0x247   :  { %v946_v32 = vsel %vm945_vm10, %v2020_v31, -inf }
 0x248   :  { %947 = vmax.xlane.f32.xlu1 %v946_v32 }
 0x251   :  { %v637_v44 = vpop.trf.xlu2 }
 0x252   :  { %v937_v46 = vsel %vm2037_vm14, %v637_v44, -1e+30 }
 0x253   :  { %v952_v47 = vsel %vm945_vm10, %v937_v46, -inf }
 0x255   :  { %v605_v39 = vpop.trf.xlu1 }
 0x256   :  { %v2033_v40 = vsel %vm2027_vm13, %v605_v39, -1e+30  ;;  %v882_v39 = vrot.slane %v2009_v24, 4 }
 0x257   :  { %v949_v41 = vsel %vm945_vm10, %v2033_v40, -inf }
 0x258   :  { %950 = vmax.xlane.f32.xlu1 %v949_v41  ;;  %vm899_vm15 = vcmp.ne.f32.partialorder %v882_v39, 0.0 }
 0x259   :  { %v909_v44 = vsel %vm899_vm15, 1, %v1870_v25 }
 0x260   :  { %953 = vmax.xlane.f32.xlu1 %v952_v47 }
 0x267   :  { %v669_v52 = vpop.trf.xlu1 }
 0x268   :  { %v2053_v53 = vsel %vm2046_vm2, %v669_v52, -1e+30  ;;  %v914_v52 = vsel %vm904_vm3, 1, %v1870_v25 }
 0x269   :  { %v955_v54 = vsel %vm945_vm10, %v2053_v53, -inf  ;;  %v924_v56 = vperm.slane %v914_v52, 0 }
 0x26a   :  { %956 = vmax.xlane.f32.xlu2 %v955_v54 }
 0x272   :  { %v733_v58 = vpop.trf.xlu2  ;;  %v701_v63 = vpop.trf.xlu0 }
 0x273   :  { %v940_v59 = vsel %vm2058_vm4, %v733_v58, -1e+30 }
 0x274   :  { %v961_v60 = vsel %vm945_vm10, %v940_v59, -inf }
 0x27d   :  { %962 = vmax.xlane.f32.xlu0 %v961_v60 }
 0x288   :  { %v765_v4 = vpop.trf.xlu0 }
 0x289   :  { %v2073_v5 = vsel %vm2067_vm6, %v765_v4, -1e+30 }
 0x28a   :  { %v964_v6 = vsel %vm945_vm10, %v2073_v5, -inf }
 0x28b   :  { %965 = vmax.xlane.f32.xlu1 %v964_v6 }
 0x293   :  { %845 = vxpose.xlu2.b32.start [1/2] (short) (narrow) %v535_v61, 8 }
 0x298   :  { %v797_v8 = vpop.trf.xlu0 }
 0x299   :  { %v2085_v12 = vsel %vm2079_vm8, %v797_v8, -1e+30 }
 0x29a   :  { %v967_v14 = vsel %vm945_vm10, %v2085_v12, -inf }
 0x29b   :  { %846 = vxpose.xlu2.b32.end [2/2] (short) (narrow) %v536_v62, 8  ;;  %968 = vmax.xlane.f32.xlu1 %v967_v14 }
 0x2a8   :  { %v829_v19 = vpop.trf.xlu0 }
 0x2a9   :  { %v2099_v21 = vsel %vm2093_vm12, %v829_v19, -1e+30 }
 0x2aa   :  { %v970_v22 = vsel %vm945_vm10, %v2099_v21, -inf }
 0x2ab   :  { %971 = vmax.xlane.f32.xlu1 %v970_v22 }
 0x2bb   :  { %v948_v23 = vpop.xlane.xlu1 %947 }
 0x2bc   :  { %v976_v51 = vsub.f32 %v2020_v31, %v948_v23 }
 0x2be   :  { %v986_v55 = vmul.f32 1.442695, %v976_v51 }
 0x2cb   :  { %v951_v26 = vpop.xlane.xlu1 %950 }
 0x2cc   :  { %v977_v57 = vsub.f32 %v2033_v40, %v951_v26 }
 0x2ce   :  { %v988_v61 = vmul.f32 1.442695, %v977_v57 }
 0x2d3   :  { %v954_v27 = vpop.xlane.xlu1 %953 }
 0x2d4   :  { %v978_v29 = vsub.f32 %v937_v46, %v954_v27  ;;  %v919_v46 = vperm.slane %v909_v44, 0 }
 0x2d6   :  { %v990_v30 = vmul.f32 1.442695, %v978_v29 }
 0x2d8   :  { %1830 = vpow2.f32 %v990_v30 }
 0x2dd   :  { %v957_v54 = vpop.xlane.xlu2 %956 }
 0x2de   :  { %v1831_v32 = vpop.eup %1830  ;;  %v979_v25 = vsub.f32 %v2053_v53, %v957_v54 }
 0x2df   :  { %v2105_v33 = vsel %vm2037_vm14, %v1831_v32, 0.0  ;;  %vm2117_vm14 = vcmp.eq.s32.totalorder %v919_v46, 1 }
 0x2e0   :  { %v1022_v34 = vsel %vm945_vm10, %v2105_v33, 0.0  ;;  %v939_v24 = vsel %vm2117_vm14, %v701_v63, -1e+30  ;;  %v992_v40 = vmul.f32 1.442695, %v979_v25 }
 0x2e1   :  { %1023 = vadd.xlane.f32.xlu1 %v1022_v34  ;;  %v958_v48 = vsel %vm945_vm10, %v939_v24, -inf }
 0x2f0   :  { %v963_v35 = vpop.xlane.xlu0 %962 }
 0x2f1   :  { %v981_v36 = vsub.f32 %v940_v59, %v963_v35 }
 0x2f3   :  { %v996_v38 = vmul.f32 1.442695, %v981_v36 }
 0x2f5   :  { %1832 = vpow2.f32 %v996_v38 }
 0x2f6   :  { %1834 = vpow2.f32 %v986_v55 }
 0x2f7   :  { %1836 = vpow2.f32 %v988_v61 }
 0x2f8   :  { %1838 = vpow2.f32 %v992_v40 }
 0x2fb   :  { %v1833_v41 = vpop.eup %1832 }
 0x2fc   :  { %v2113_v45 = vsel %vm2058_vm4, %v1833_v41, 0.0  ;;  %vm2129_vm4 = vcmp.eq.s32.totalorder %v924_v56, 1  ;;  %v1835_v31 = vpop.eup %1834 }
 0x2fd   :  { %v1031_v42 = vsel %vm945_vm10, %v2113_v45, 0.0  ;;  %v2139_v63 = vsel %vm2013_vm9, %v1835_v31, 0.0  ;;  %v1837_v1 = vpop.eup %1836 }
 0x2fe   :  { %1032 = vadd.xlane.f32.xlu1 %v1031_v42  ;;  %v1016_v0 = vsel %vm945_vm10, %v2139_v63, 0.0  ;;  %v2145_v2 = vsel %vm2027_vm13, %v1837_v1, 0.0  ;;  %v1839_v53 = vpop.eup %1838  ;;  %v966_v7 = vpop.xlane.xlu1 %965 }
 0x2ff   :  { %v1019_v4 = vsel %vm945_vm10, %v2145_v2, 0.0  ;;  %v2151_v28 = vsel %vm2046_vm2, %v1839_v53, 0.0  ;;  %v982_v34 = vsub.f32 %v2073_v5, %v966_v7 }
 0x300   :  { %v1025_v6 = vsel %vm945_vm10, %v2151_v28, 0.0 }
 0x301   :  { %v998_v35 = vmul.f32 1.442695, %v982_v34 }
 0x30c   :  { %959 = vmax.xlane.f32.xlu2 %v958_v48 }
 0x30e   :  { %v969_v37 = vpop.xlane.xlu1 %968 }
 0x30f   :  { %v983_v36 = vsub.f32 %v2085_v12, %v969_v37 }
 0x311   :  { %v1000_v38 = vmul.f32 1.442695, %v983_v36 }
 0x317   :  { %1176 = vrot.lane.b32.xlu1 %v1945_v13, %s1871_s5 }
 0x31e   :  { %v972_v8 = vpop.xlane.xlu1 %971 }
 0x31f   :  { %v984_v9 = vsub.f32 %v2099_v21, %v972_v8 }
 0x321   :  { %v1002_v10 = vmul.f32 1.442695, %v984_v9 }
 0x323   :  { %1840 = vpow2.f32 %v1002_v10 }
 0x329   :  { %v1841_v17 = vpop.eup %1840 }
 0x32a   :  { %v2167_v23 = vsel %vm2093_vm12, %v1841_v17, 0.0 }
 0x32b   :  { %v1040_v21 = vsel %vm945_vm10, %v2167_v23, 0.0 }
 0x32c   :  { %v861_v59 = vpop.trf.xlu2 }
 0x32d   :  { %v944_v60 = vsel %vm2129_vm4, %v861_v59, -1e+30 }
 0x32e   :  { %v973_v62 = vsel %vm945_vm10, %v944_v60, -inf }
 0x32f   :  { %974 = vmax.xlane.f32.xlu2 %v973_v62 }
 0x337   :  { %1017 = vadd.xlane.f32.xlu2 %v1016_v0 }
 0x33f   :  { %1020 = vadd.xlane.f32.xlu2 %v1019_v4 }
 0x347   :  { %1026 = vadd.xlane.f32.xlu2 %v1025_v6 }
 0x354   :  { %v1024_v47 = vpop.xlane.xlu1 %1023 }
 0x35f   :  { %1188 = vrot.lane.b32.xlu2 %v1945_v13, %s1872_s22 }
 0x367   :  { %1178 = vrot.lane.b32.xlu2 %v1949_v16, %s1871_s5 }
 0x371   :  { %v1033_v51 = vpop.xlane.xlu1 %1032 }
 0x372   :  { %v2198_v55 = vmax.f32 %v1033_v51, 1e-30 }
 0x37f   :  { %v960_v14 = vpop.xlane.xlu2 %959 }
 0x380   :  { %v980_v50 = vsub.f32 %v939_v24, %v960_v14  ;;  %v1048_v24 = vmax.f32 %v1024_v47, 1e-30 }
 0x382   :  { %v994_v15 = vmul.f32 1.442695, %v980_v50  ;;  %vm1091_vm9 = vweird.f32 %v1048_v24  ;;  %v1097_v31 = vand.u32 2147483648, %v1048_v24  ;;  %v1095_v0 = vand.u32 2147483647, %v1048_v24 }
 0x384   :  { %1842 = vpow2.f32 %v994_v15  ;;  %v1098_v6 = vor.u32 1.1754944e-38, %v1097_v31  ;;  %vm1096_vm2 = vcmp.eq.f32.partialorder %v1095_v0, 8.507059e+37 }
 0x38a   :  { %v1843_v18 = vpop.eup %1842 }
 0x38b   :  { %v2161_v19 = vsel %vm2117_vm14, %v1843_v18, 0.0 }
 0x38c   :  { %v1028_v22 = vsel %vm945_vm10, %v2161_v19, 0.0 }
 0x38d   :  { %1029 = vadd.xlane.f32.xlu0 %v1028_v22 }
 0x390   :  { %1041 = vadd.xlane.f32.xlu2 %v1040_v21 }
 0x3a1   :  { %1182 = vrot.lane.b32.xlu0 %v1945_v13, %s1873_s23 }
 0x3a2   :  { %v975_v26 = vpop.xlane.xlu2 %974 }
 0x3a3   :  { %v985_v27 = vsub.f32 %v944_v60, %v975_v26 }
 0x3a5   :  { %v1004_v29 = vmul.f32 1.442695, %v985_v27  ;;  %v1140_v27 = vand.u32 2147483647, %v2198_v55 }
 0x3a7   :  { %1844 = vpow2.f32 %v1004_v29  ;;  %vm2261_vm14 = vcmp.eq.f32.partialorder %v1140_v27, 8.507059e+37 }
 0x3a8   :  { %1846 = vpow2.f32 %v998_v35  ;;  %v2240_v35 = vpop.permute.xlu1 %1176 }
 0x3a9   :  { %1190 = vrot.lane.b32.xlu0 %v1949_v16, %s1872_s22  ;;  %1848 = vpow2.f32 %v1000_v38 }
 0x3aa   :  { %v1018_v12 = vpop.xlane.xlu2 %1017  ;;  %1850 = vrcp.f32 %v1048_v24 }
 0x3ab   :  { %v2196_v11 = vmax.f32 %v1018_v12, 1e-30 }
 0x3ad   :  { %v1845_v30 = vpop.eup %1844  ;;  %v1065_v34 = vand.u32 2147483647, %v2196_v11  ;;  %v1067_v36 = vand.u32 2147483648, %v2196_v11  ;;  %vm1061_vm12 = vweird.f32 %v2196_v11 }
 0x3ae   :  { %v2175_v20 = vsel %vm2129_vm4, %v1845_v30, 0.0  ;;  %v1847_v39 = vpop.eup %1846 }
 0x3af   :  { %v1043_v32 = vsel %vm945_vm10, %v2175_v20, 0.0  ;;  %v2183_v41 = vsel %vm2067_vm6, %v1847_v39, 0.0  ;;  %v1849_v42 = vpop.eup %1848  ;;  %vm1136_vm6 = vweird.f32 %v2198_v55  ;;  %vm2271_vm4 = vcmp.eq.f32.partialorder %v1065_v34, 8.507059e+37 }
 0x3b0   :  { %1044 = vadd.xlane.f32.xlu1 %v1043_v32  ;;  %v1034_v44 = vsel %vm945_vm10, %v2183_v41, 0.0  ;;  %v2189_v46 = vsel %vm2079_vm8, %v1849_v42, 0.0  ;;  %v1851_v49 = vpop.eup %1850  ;;  %v1142_v32 = vand.u32 2147483648, %v2198_v55 }
 0x3b1   :  { %v1037_v5 = vsel %vm945_vm10, %v2189_v46, 0.0  ;;  %v1087_v54 = vmul.f32 %v1851_v49, %v1048_v24  ;;  %vm1092_vm10 = vweird.f32 %v1851_v49  ;;  %v1874_v24 = vmov 1983009808  }
 0x3b2   :  { %v1021_v3 = vpop.xlane.xlu2 %1020  ;;  %vm1093_vm13 = vmor %vm1091_vm9, %vm1092_vm10  ;;  %v1143_v47 = vor.u32 1.1754944e-38, %v1142_v32  ;;  %vm1195_vm9 = vcmask 1047556  }
 0x3b3   :  { %v1088_v56 = vsub.f32 1.0, %v1087_v54  ;;  %v2202_v57 = vmax.f32 %v1021_v3, 1e-30 }
 0x3b5   :  { %v1089_v58 = vmul.f32 %v1851_v49, %v1088_v56 }
 0x3b7   :  { %v1090_v40 = vadd.f32 %v1851_v49, %v1089_v58 }
 0x3b9   :  { %v1094_v37 = vsel %vm1093_vm13, %v1851_v49, %v1090_v40 }
 0x3ba   :  { %v1027_v48 = vpop.xlane.xlu2 %1026  ;;  %v1099_v15 = vsel %vm1096_vm2, %v1098_v6, %v1094_v37  ;;  %v1082_v6 = vand.u32 2147483648, %v2202_v57 }
 0x3bb   :  { %v2194_v52 = vmax.f32 %v1027_v48, 1e-30  ;;  %v2233_v26 = vmul.f32 %v1099_v15, %v2105_v33  ;;  %v1200_v48 = vunpack.c.l.s4 %v1874_v24 }
 0x3bc   :  { %v1083_v27 = vor.u32 1.1754944e-38, %v1082_v6 }
 0x3bd   :  { %1852 = vrcp.f32 %v2194_v52  ;;  %v1112_v39 = vand.u32 2147483648, %v2194_v52  ;;  %vm1106_vm11 = vweird.f32 %v2194_v52  ;;  %v1110_v42 = vand.u32 2147483647, %v2194_v52 }
 0x3be   :  { %1854 = vrcp.f32 %v2196_v11 }
 0x3bf   :  { %1856 = vrcp.f32 %v2198_v55  ;;  %v1113_v40 = vor.u32 1.1754944e-38, %v1112_v39  ;;  %vm1111_vm2 = vcmp.eq.f32.partialorder %v1110_v42, 8.507059e+37  ;;  %v1269_v39 = vrot.slane %v2233_v26, 4 }
 0x3c0   :  { %1858 = vrcp.f32 %v2202_v57 }
 0x3c2   :  { %v2205_v59 = vpop.permute.xlu2 %1188 }
 0x3c3   :  { %v2207_v60 = vpop.eup %1852 }
 0x3c4   :  { %v2210_v62 = vpop.eup %1854  ;;  %v1102_v1 = vmul.f32 %v2207_v60, %v2194_v52  ;;  %vm1107_vm5 = vweird.f32 %v2207_v60 }
 0x3c5   :  { %v2212_v25 = vpop.eup %1856  ;;  %v1057_v4 = vmul.f32 %v2210_v62, %v2196_v11  ;;  %vm1062_vm7 = vweird.f32 %v2210_v62  ;;  %vm2255_vm15 = vmor %vm1106_vm11, %vm1107_vm5  ;;  %v1068_v11 = vor.u32 1.1754944e-38, %v1067_v36  ;;  %vm1076_vm5 = vweird.f32 %v2202_v57 }
 0x3c6   :  { %v2218_v53 = vpop.eup %1858  ;;  %v1132_v7 = vmul.f32 %v2212_v25, %v2198_v55  ;;  %v1103_v8 = vsub.f32 1.0, %v1102_v1  ;;  %vm1137_vm8 = vweird.f32 %v2212_v25  ;;  %vm2267_vm3 = vmor %vm1061_vm12, %vm1062_vm7 }
 0x3c7   :  { %v1058_v9 = vsub.f32 1.0, %v1057_v4  ;;  %v1072_v14 = vmul.f32 %v2218_v53, %v2202_v57  ;;  %vm2284_vm10 = vmor %vm1136_vm6, %vm1137_vm8  ;;  %vm1077_vm13 = vweird.f32 %v2218_v53  ;;  %v1080_v4 = vand.u32 2147483647, %v2202_v57 }
 0x3c8   :  { %v1133_v17 = vsub.f32 1.0, %v1132_v7  ;;  %v1104_v22 = vmul.f32 %v2207_v60, %v1103_v8  ;;  %v2302_v7 = vunpack.c.0.s8 %v1200_v48  ;;  %vm2313_vm6 = vmor %vm1076_vm5, %vm1077_vm13 }
 0x3c9   :  { %v1059_v21 = vmul.f32 %v2210_v62, %v1058_v9  ;;  %v1073_v29 = vsub.f32 1.0, %v1072_v14  ;;  %vm1081_vm7 = vcmp.eq.f32.partialorder %v1080_v4, 8.507059e+37 }
 0x3ca   :  { %v2226_v50 = vpop.permute.xlu2 %1178  ;;  %v1134_v30 = vmul.f32 %v2212_v25, %v1133_v17  ;;  %v1105_v38 = vadd.f32 %v2207_v60, %v1104_v22  ;;  %v1207_v22 = vrot.slane %v2205_v59, 4 }
 0x3cb   :  { %v1060_v33 = vadd.f32 %v2210_v62, %v1059_v21 }
 0x3cc   :  { %v1135_v12 = vadd.f32 %v2212_v25, %v1134_v30  ;;  %v1109_v56 = vsel %vm2255_vm15, %v2207_v60, %v1105_v38  ;;  %v1875_v38 = vmov 1934713408  }
 0x3cd   :  { %v1064_v31 = vsel %vm2267_vm3, %v2210_v62, %v1060_v33  ;;  %v1114_v62 = vsel %vm1111_vm2, %v1113_v40, %v1109_v56 }
 0x3ce   :  { %v1139_v37 = vsel %vm2284_vm10, %v2212_v25, %v1135_v12  ;;  %v1069_v8 = vsel %vm2271_vm4, %v1068_v11, %v1064_v31  ;;  %v1115_v17 = vmul.f32 %v1114_v62, %v2151_v28  ;;  %v1224_v28 = vunpack.c.l.s4 %v1875_v38 }
 0x3cf   :  { %v1070_v21 = vmul.f32 %v1069_v8, %v2139_v63 }
 0x3d0   :  { %v1275_v63 = vrot.slane %v1115_v17, 4  ;;  %v2348_v48 = vunpack.c.0.s8 %v1224_v28 }
 0x3d1   :  { %v1270_v24 = vsel %vm1195_vm9, %v1269_v39, %v1070_v21 }
 0x3d2   :  { %v2361_v31 = vperm.slane %v1270_v24, %v2302_v7 }
 0x3d3   :  { %1035 = vadd.xlane.f32.xlu0 %v1034_v44  ;;  %v1074_v44 = vmul.f32 %v2218_v53, %v1073_v29 }
 0x3d5   :  { %v1075_v1 = vadd.f32 %v2218_v53, %v1074_v44  ;;  %v1208_v44 = vsel %vm1195_vm9, %v1207_v22, %v2240_v35 }
 0x3d7   :  { %v1079_v57 = vsel %vm2313_vm6, %v2218_v53, %v1075_v1 }
 0x3d8   :  { %v1084_v53 = vsel %vm1081_vm7, %v1083_v27, %v1079_v57 }
 0x3d9   :  { %v1085_v12 = vmul.f32 %v1084_v53, %v2145_v2 }
 0x3db   :  { %1038 = vadd.xlane.f32.xlu0 %v1037_v5  ;;  %v1276_v2 = vsel %vm1195_vm9, %v1275_v63, %v1085_v12 }
 0x3ef   :  { %1184 = vrot.lane.b32.xlu0 %v1949_v16, %s1873_s23 }
 0x400   :  { %v1030_v61 = vpop.xlane.xlu0 %1029 }
 0x401   :  { %v2228_v18 = vmax.f32 %v1030_v61, 1e-30 }
 0x403   :  { %1860 = vrcp.f32 %v2228_v18  ;;  %v1042_v5 = vpop.xlane.xlu2 %1041  ;;  %v1125_v51 = vand.u32 2147483647, %v2228_v18  ;;  %vm1121_vm11 = vweird.f32 %v2228_v18 }
 0x404   :  { %v2291_v0 = vmax.f32 %v1042_v5, 1e-30 }
 0x405   :  { %vm2375_vm12 = vcmp.eq.f32.partialorder %v1125_v51, 8.507059e+37 }
 0x406   :  { %1862 = vrcp.f32 %v2291_v0  ;;  %vm1330_vm2 = vweird.f32 %v2291_v0 }
 0x409   :  { %v2278_v58 = vpop.eup %1860 }
 0x40a   :  { %v1117_v9 = vmul.f32 %v2278_v58, %v2228_v18  ;;  %vm1122_vm8 = vweird.f32 %v2278_v58 }
 0x40b   :  { %vm2382_vm15 = vmor %vm1121_vm11, %vm1122_vm8 }
 0x40c   :  { %v1118_v32 = vsub.f32 1.0, %v1117_v9  ;;  %v2338_v42 = vpop.eup %1862 }
 0x40d   :  { %v1326_v54 = vmul.f32 %v2338_v42, %v2291_v0  ;;  %vm1331_vm4 = vweird.f32 %v2338_v42 }
 0x40e   :  { %v1119_v3 = vmul.f32 %v2278_v58, %v1118_v32 }
 0x413   :  { %v2222_v10 = vpop.permute.xlu0 %1182 }
 0x414   :  { %v1194_v60 = vrot.slane %v2222_v10, 4  ;;  %v1198_v55 = vsel %vm1195_vm9, %v2222_v10, %v106_v43  ;;  %v1209_v10 = vrot.slane %v2240_v35, 4  ;;  %v1214_v35 = vperm.slane %v1208_v44, %v2302_v7 }
 0x415   :  { %v1206_v15 = vperm.slane %v1198_v55, %v2302_v7 }
 0x416   :  { %v1196_v25 = vsel %vm1195_vm9, %v1194_v60, %v1945_v13  ;;  %v1210_v13 = vsel %vm1195_vm9, %v2205_v59, %v1209_v10  ;;  %v1144_v59 = vsel %vm2261_vm14, %v1143_v47, %v1139_v37  ;;  %v1127_v47 = vand.u32 2147483648, %v2228_v18 }
 0x417   :  { %v1202_v34 = vperm.slane %v1196_v25, %v2302_v7  ;;  %v1233_v33 = vrot.slane %v1206_v15, 4  ;;  %v1218_v5 = vperm.slane %v1210_v13, %v2302_v7  ;;  %v2357_v11 = vmul.f32 %v1144_v59, %v2113_v45 }
 0x418   :  { %v1120_v60 = vadd.f32 %v2278_v58, %v1119_v3  ;;  %v1219_v45 = vrot.slane %v1214_v35, 4  ;;  %v2373_v37 = vperm.slane %v1276_v2, %v2302_v7  ;;  %v1128_v9 = vor.u32 1.1754944e-38, %v1127_v47 }
 0x419   :  { %v1221_v26 = vrot.slane %v1202_v34, 4  ;;  %v1234_v52 = vsel %vm1195_vm9, %v1218_v5, %v1233_v33  ;;  %v1231_v56 = vrot.slane %v1218_v5, 4 }
 0x41a   :  { %v1242_v55 = vperm.slane %v1234_v52, %v2348_v48  ;;  %v1220_v18 = vsel %vm1195_vm9, %v1219_v45, %v1202_v34  ;;  %v1124_v17 = vsel %vm2382_vm15, %v2278_v58, %v1120_v60 }
 0x41b   :  { %v2259_v49 = vpop.permute.xlu0 %1190  ;;  %v1222_v1 = vsel %vm1195_vm9, %v1214_v35, %v1221_v26  ;;  %v1232_v25 = vsel %vm1195_vm9, %v1231_v56, %v1206_v15  ;;  %v1336_v15 = vand.u32 2147483648, %v2291_v0  ;;  %v1226_v53 = vperm.slane %v1220_v18, %v2348_v48 }
 0x41c   :  { %v1230_v14 = vperm.slane %v1222_v1, %v2348_v48  ;;  %v1249_v22 = vrot.slane %v1242_v55, 4  ;;  %v1238_v58 = vperm.slane %v1232_v25, %v2348_v48  ;;  %v1129_v38 = vsel %vm2375_vm12, %v1128_v9, %v1124_v17  ;;  %vm2442_vm12 = vmor %vm1330_vm2, %vm1331_vm4 }
 0x41d   :  { %v1257_v44 = vrot.slane %v2259_v49, 4  ;;  %vm1767_vm2 = vcmask 64512  }
 0x41e   :  { %v1245_v28 = vrot.slane %v1230_v14, 4  ;;  %v1250_v63 = vsel %vm1195_vm9, 0.0, %v1249_v22  ;;  %v1390_v12 = vsel %vm1195_vm9, %v1249_v22, %v1238_v58  ;;  %v1247_v35 = vrot.slane %v1238_v58, 4 }
 0x41f   :  { %v1395_v51 = vrot.slane %v1250_v63, 4  ;;  %v2417_v2 = vperm.slane %v1390_v12, %v2302_v7  ;;  %v1258_v56 = vsel %vm1195_vm9, %v1257_v44, %v2226_v50 }
 0x420   :  { %v1248_v45 = vsel %vm1195_vm9, 0.0, %v1247_v35  ;;  %v1262_v9 = vperm.slane %v1258_v56, %v2302_v7  ;;  %v1379_v18 = vsel %vm1195_vm9, %v1245_v28, %v1226_v53 }
 0x421   :  { %v1396_v50 = vsel %vm1195_vm9, %v1395_v51, %v1248_v45 }
 0x423   :  { %v1045_v43 = vpop.xlane.xlu1 %1044 }
 0x424   :  { %v2327_v29 = vmax.f32 %v1045_v43, 1e-30  ;;  %v1327_v43 = vsub.f32 1.0, %v1326_v54  ;;  %v1246_v54 = vsel %vm1195_vm9, 0.0, %v1245_v28  ;;  %v1337_v28 = vor.u32 1.1754944e-38, %v1336_v15 }
 0x425   :  { %v1384_v8 = vrot.slane %v1246_v54, 4 }
 0x426   :  { %v1328_v34 = vmul.f32 %v2338_v42, %v1327_v43  ;;  %v1355_v17 = vand.u32 2147483648, %v2327_v29  ;;  %vm1349_vm15 = vweird.f32 %v2327_v29 }
 0x428   :  { %v2411_v24 = vadd.f32 %v2338_v42, %v1328_v34  ;;  %v1356_v15 = vor.u32 1.1754944e-38, %v1355_v17 }
 0x42a   :  { %v1333_v58 = vsel %vm2442_vm12, %v2338_v42, %v2411_v24 }
 0x446   :  { %v1036_v30 = vpop.xlane.xlu0 %1035 }
 0x447   :  { %v2332_v36 = vmax.f32 %v1036_v30, 1e-30  ;;  %v1334_v30 = vand.u32 2147483647, %v2291_v0  ;;  %v1263_v0 = vrot.slane %v1262_v9, 4 }
 0x449   :  { %1864 = vrcp.f32 %v2332_v36  ;;  %v1157_v27 = vand.u32 2147483648, %v2332_v36  ;;  %v1155_v32 = vand.u32 2147483647, %v2332_v36  ;;  %vm1151_vm3 = vweird.f32 %v2332_v36 }
 0x44a   :  { %1866 = vrcp.f32 %v2327_v29 }
 0x44b   :  { %v1158_v5 = vor.u32 1.1754944e-38, %v1157_v27  ;;  %vm1156_vm13 = vcmp.eq.f32.partialorder %v1155_v32, 8.507059e+37  ;;  %v1400_v27 = vperm.slane %v1396_v50, %v2302_v7  ;;  %v1353_v32 = vand.u32 2147483647, %v2327_v29 }
 0x44d   :  { %vm1354_vm4 = vcmp.eq.f32.partialorder %v1353_v32, 8.507059e+37  ;;  %v1413_v12 = vrot.slane %v1400_v27, 4 }
 0x44e   :  { %v1039_v61 = vpop.xlane.xlu0 %1038 }
 0x44f   :  { %v1865_v40 = vpop.eup %1864  ;;  %v2366_v4 = vmax.f32 %v1039_v61, 1e-30  ;;  %v1414_v56 = vsel %vm1195_vm9, %v1413_v12, %v2417_v2 }
 0x450   :  { %v2368_v6 = vpop.eup %1866  ;;  %v1147_v62 = vmul.f32 %v1865_v40, %v2332_v36  ;;  %vm1152_vm14 = vweird.f32 %v1865_v40  ;;  %v1243_v36 = vrot.slane %v1226_v53, 4 }
 0x451   :  { %1868 = vrcp.f32 %v2366_v4  ;;  %v1345_v21 = vmul.f32 %v2368_v6, %v2327_v29  ;;  %vm1153_vm10 = vmor %vm1151_vm3, %vm1152_vm14  ;;  %v1170_v55 = vand.u32 2147483647, %v2366_v4  ;;  %vm1166_vm6 = vweird.f32 %v2366_v4 }
 0x452   :  { %v1148_v57 = vsub.f32 1.0, %v1147_v62  ;;  %v1244_v62 = vsel %vm1195_vm9, 0.0, %v1243_v36  ;;  %vm1350_vm7 = vweird.f32 %v2368_v6  ;;  %vm2455_vm14 = vcmp.eq.f32.partialorder %v1334_v30, 8.507059e+37 }
 0x453   :  { %v1346_v59 = vsub.f32 1.0, %v1345_v21  ;;  %vm1171_vm11 = vcmp.eq.f32.partialorder %v1170_v55, 8.507059e+37  ;;  %v1385_v21 = vsel %vm1195_vm9, %v1384_v8, %v1244_v62  ;;  %vm2463_vm3 = vmor %vm1349_vm15, %vm1350_vm7  ;;  %v1383_v30 = vperm.slane %v1379_v18, %v2302_v7 }
 0x454   :  { %v1149_v13 = vmul.f32 %v1865_v40, %v1148_v57  ;;  %v1389_v44 = vperm.slane %v1385_v21, %v2302_v7  ;;  %v1338_v35 = vsel %vm2455_vm14, %v1337_v28, %v1333_v58 }
 0x455   :  { %v1347_v61 = vmul.f32 %v2368_v6, %v1346_v59  ;;  %v1403_v36 = vrot.slane %v1383_v30, 4  ;;  %v1339_v9 = vmul.f32 %v1338_v35, %v2167_v23 }
 0x456   :  { %v1150_v33 = vadd.f32 %v1865_v40, %v1149_v13 }
 0x457   :  { %v1869_v39 = vpop.eup %1868  ;;  %v1348_v14 = vadd.f32 %v2368_v6, %v1347_v61  ;;  %v1404_v45 = vsel %vm1195_vm9, %v1389_v44, %v1403_v36 }
 0x458   :  { %v1154_v3 = vsel %vm1153_vm10, %v1865_v40, %v1150_v33  ;;  %v1162_v26 = vmul.f32 %v1869_v39, %v2366_v4  ;;  %v1172_v40 = vand.u32 2147483648, %v2366_v4  ;;  %vm1167_vm5 = vweird.f32 %v1869_v39 }
 0x459   :  { %v1159_v52 = vsel %vm1156_vm13, %v1158_v5, %v1154_v3  ;;  %vm1168_vm8 = vmor %vm1166_vm6, %vm1167_vm5  ;;  %vm1466_vm10 = vcmask 1041408   ;;  %vm1459_vm13 = vcmask 80896   ;;  %vm1772_vm5 = vcmask 195584  }
 0x45a   :  { %v1160_v49 = vmul.f32 %v1159_v52, %v2183_v41  ;;  %v1163_v47 = vsub.f32 1.0, %v1162_v26  ;;  %v1130_v41 = vmul.f32 %v1129_v38, %v2161_v19  ;;  %v1173_v10 = vor.u32 1.1754944e-38, %v1172_v40 }
 0x45b   :  { %v1415_v19 = vrot.slane %v2417_v2, 4  ;;  %v1295_v40 = vrot.slane %v2361_v31, 4  ;;  %vm1776_vm6 = vcmask 254976  }
 0x45c   :  { %v1281_v60 = vrot.slane %v1160_v49, 4  ;;  %v1164_v1 = vmul.f32 %v1869_v39, %v1163_v47  ;;  %v1401_v49 = vrot.slane %v1389_v44, 4 }
 0x45d   :  { %v1416_v59 = vsel %vm1195_vm9, %v1400_v27, %v1415_v19  ;;  %v1296_v50 = vsel %vm1195_vm9, %v2373_v37, %v1295_v40  ;;  %v1343_v27 = vperm.slane %v1339_v9, %v2302_v7 }
 0x45e   :  { %v1165_v43 = vadd.f32 %v1869_v39, %v1164_v1  ;;  %v1282_v57 = vsel %vm1195_vm9, %v1281_v60, %v1130_v41  ;;  %v2485_v52 = vperm.slane %v1416_v59, %v2348_v48  ;;  %v1293_v60 = vrot.slane %v2373_v37, 4 }
 0x45f   :  { %v1402_v2 = vsel %vm1195_vm9, %v1401_v49, %v1383_v30 }
 0x460   :  { %v1169_v25 = vsel %vm1168_vm8, %v1869_v39, %v1165_v43  ;;  %v1352_v39 = vsel %vm2463_vm3, %v2368_v6, %v1348_v14  ;;  %v1429_v43 = vrot.slane %v2485_v52, 4  ;;  %v1408_v23 = vperm.slane %v1402_v2, %v2348_v48 }
 0x461   :  { %v1174_v22 = vsel %vm1171_vm11, %v1173_v10, %v1169_v25  ;;  %v1185_v4 = vpop.permute.xlu0 %1184  ;;  %v1357_v24 = vsel %vm1354_vm4, %v1356_v15, %v1352_v39  ;;  %v1412_v25 = vperm.slane %v1404_v45, %v2348_v48  ;;  %v1365_v39 = vrot.slane %v1343_v27, 4 }
 0x462   :  { %v1175_v34 = vmul.f32 %v1174_v22, %v2189_v46  ;;  %v1251_v53 = vrot.slane %v1185_v4, 4  ;;  %v1286_v46 = vperm.slane %v1282_v57, %v2302_v7  ;;  %v1358_v61 = vmul.f32 %v1357_v24, %v2175_v20 }
 0x463   :  { %v1420_v20 = vperm.slane %v1414_v56, %v2348_v48  ;;  %v1294_v22 = vsel %vm1195_vm9, %v1293_v60, %v2361_v31  ;;  %v1304_v4 = vperm.slane %v1296_v50, %v2348_v48  ;;  %v1430_v58 = vsel %vm1195_vm9, %v1429_v43, %v1412_v25 }
 0x464   :  { %v1287_v33 = vrot.slane %v1175_v34, 4  ;;  %v1252_v42 = vsel %vm1195_vm9, %v1251_v53, %v1949_v16  ;;  %v1307_v26 = vrot.slane %v1286_v46, 4  ;;  %v1362_v18 = vperm.slane %v1358_v61, %v2302_v7 }
 0x465   :  { %v1256_v63 = vperm.slane %v1252_v42, %v2302_v7  ;;  %v1425_v21 = vrot.slane %v1420_v20, 4  ;;  %v1300_v38 = vperm.slane %v1294_v22, %v2348_v48  ;;  %v1427_v29 = vrot.slane %v1408_v23, 4 }
 0x466   :  { %v1288_v5 = vsel %vm1195_vm9, %v1287_v33, %v2357_v11  ;;  %v1363_v34 = vrot.slane %v1362_v18, 4  ;;  %v1431_v33 = vrot.slane %v1412_v25, 4  ;;  %v1366_v59 = vsel %vm1195_vm9, %v1362_v18, %v1365_v39 }
 0x467   :  { %v1264_v16 = vsel %vm1195_vm9, %v1263_v0, %v1256_v63  ;;  %v1292_v3 = vperm.slane %v1288_v5, %v2302_v7  ;;  %v1319_v15 = vrot.slane %v1300_v38, 4  ;;  %v1428_v44 = vsel %vm1195_vm9, %v1420_v20, %v1427_v29 }
 0x468   :  { %v1268_v6 = vperm.slane %v1264_v16, %v2348_v48  ;;  %v1364_v0 = vsel %vm1195_vm9, %v1363_v34, %v1343_v27  ;;  %v1432_v5 = vsel %vm1195_vm9, %v2485_v52, %v1431_v33 }
 0x469   :  { %v1308_v51 = vsel %vm1195_vm9, %v1292_v3, %v1307_v26  ;;  %v1305_v11 = vrot.slane %v1292_v3, 4  ;;  %v1370_v16 = vperm.slane %v1364_v0, %v2348_v48  ;;  %v1374_v3 = vperm.slane %v1366_v59, %v2348_v48 }
 0x46a   :  { %v1436_v47 = vperm.slane %v1268_v6, %v2302_v7  ;;  %v1437_v54 = vrot.slane %v1268_v6, 4  ;;  %v2498_v62 = vperm.slane %v1308_v51, %v2348_v48  ;;  %v1323_v6 = vrot.slane %v1304_v4, 4 }
 0x46b   :  { %v1306_v1 = vsel %vm1195_vm9, %v1305_v11, %v1286_v46  ;;  %v1426_v46 = vsel %vm1195_vm9, %v1425_v21, %v1408_v23  ;;  %v1375_v26 = vrot.slane %v1370_v16, 4  ;;  %v1377_v35 = vrot.slane %v1374_v3, 4 }
 0x46c   :  { %v1438_v55 = vsel %vm1195_vm9, 0.0, %v1437_v54  ;;  %v1445_v41 = vrot.slane %v1436_v47, 4  ;;  %v1312_v10 = vperm.slane %v1306_v1, %v2348_v48  ;;  %v1321_v17 = vrot.slane %v2498_v62, 4 }
 0x46d   :  { %v1442_v8 = vperm.slane %v1438_v55, %v2302_v7  ;;  %v1376_v24 = vsel %vm1195_vm9, 0.0, %v1375_v26  ;;  %v1324_v36 = vsel %vm1195_vm9, %v2498_v62, %v1323_v6  ;;  %v1378_v52 = vsel %vm1195_vm9, 0.0, %v1377_v35 }
 0x46e   :  { %v1317_v32 = vrot.slane %v1312_v10, 4  ;;  %v1322_v28 = vsel %vm1195_vm9, %v1321_v17, %v1304_v4  ;;  %v1320_v12 = vsel %vm1195_vm9, %v1312_v10, %v1319_v15 }
 0x46f   :  { %v1446_v19 = vsel %vm1195_vm9, %v1442_v8, %v1445_v41  ;;  %v1443_v14 = vrot.slane %v1442_v8, 4 }
 0x470   :  { %v1454_v57 = vperm.slane %v1446_v19, %v2348_v48  ;;  %v1318_v42 = vsel %vm1195_vm9, %v1317_v32, %v1300_v38 }
 0x471   :  { %v1444_v37 = vsel %vm1195_vm9, %v1443_v14, %v1436_v47 }
 0x472   :  { %1805 = vmatpush.msk.msrb.mxu3 %vm1466_vm10, %v1454_v57  ;;  %v1450_v13 = vperm.slane %v1444_v37, %v2348_v48  ;;  %v1457_v53 = vrot.slane %v1454_v57, 4 }
 0x474   :  { %v1455_v31 = vrot.slane %v1450_v13, 4  ;;  %1799 = vmatpush.msk.msrb.mxu1 %vm1466_vm10, %v1450_v13  ;;  %1549 = vmatpush.msrb.mxu3 %v1430_v58  ;;  %v1458_v63 = vsel %vm1195_vm9, 0.0, %v1457_v53 }
 0x475   :  { %1806 = vmatmul.msk.f32.vlgmr.msrb.gmra.mxu3 %vm1459_vm13, %v1322_v28 }
 0x476   :  { %1485 = vmatpush.msrb.mxu1 %v1426_v46  ;;  %v1456_v30 = vsel %vm1195_vm9, 0.0, %v1455_v31 }
 0x477   :  { %1800 = vmatmul.msk.f32.vlgmr.msrb.gmra.mxu1 %vm1459_vm13, %v1318_v42  ;;  %1802 = vmatpush.msk.msra.mxu0 %vm1466_vm10, %v1456_v30 }
 0x478   :  { %1808 = vmatpush.msk.msra.mxu1 %vm1466_vm10, %v1458_v63 }
 0x479   :  { %1517 = vmatpush.msra.mxu0 %v1428_v44 }
 0x47a   :  { %1581 = vmatpush.msra.mxu1 %v1432_v5  ;;  %1803 = vmatmul.msk.f32.vlgmr.msra.gmra.mxu0 %vm1459_vm13, %v1320_v12 }
 0x47d   :  { %1807 = vmatmul.msk.f32.gmra.mxu3 %vm1459_vm13, %v1374_v3 }
 0x47f   :  { %1801 = vmatmul.msk.f32.gmra.mxu1 %vm1459_vm13, %v1370_v16 }
 0x482   :  { %1804 = vmatmul.msk.f32.gmra.mxu0 %vm1459_vm13, %v1376_v24 }
 0x487   :  { %1809 = vmatmul.msk.f32.vlgmr.msra.gmra.mxu1 %vm1459_vm13, %v1324_v36 }
 0x48f   :  { %1810 = vmatmul.msk.f32.gmra.mxu1 %vm1459_vm13, %v1378_v52 }
 0x4f4   :  { %v1487_v51 = vpop.f32.mrf.mxu1 }
 0x4f5   :  { %v1591_v47 = vrot.slane %v1487_v51, 4 }
 0x4f7   :  { %v1519_v61 = vpop.f32.mrf.mxu0 }
 0x4f8   :  { %v1551_v49 = vpop.f32.mrf.mxu3  ;;  %v1603_v1 = vrot.slane %v1519_v61, 4 }
 0x4f9   :  { %v1589_v54 = vrot.slane %v1551_v49, 4  ;;  %v1592_v56 = vsel %vm1195_vm9, %v1551_v49, %v1591_v47 }
 0x4fa   :  { %v1600_v60 = vperm.slane %v1592_v56, %v2302_v7 }
 0x4fb   :  { %v1590_v40 = vsel %vm1195_vm9, %v1589_v54, %v1487_v51 }
 0x4fc   :  { %v1490_v11 = vpop.f32.mrf.mxu1  ;;  %v1596_v55 = vperm.slane %v1590_v40, %v2302_v7  ;;  %v1627_v8 = vrot.slane %v1600_v60, 4 }
 0x4fe   :  { %v1615_v43 = vrot.slane %v1596_v55, 4 }
 0x4ff   :  { %v1522_v28 = vpop.f32.mrf.mxu0 }
 0x500   :  { %v1554_v20 = vpop.f32.mrf.mxu3 }
 0x501   :  { %v1645_v14 = vrot.slane %v1554_v20, 4 }
 0x503   :  { %v1646_v53 = vsel %vm1195_vm9, %v1645_v14, %v1490_v11 }
 0x504   :  { %v1583_v41 = vpop.f32.mrf.mxu1  ;;  %v1650_v12 = vperm.slane %v1646_v53, %v2302_v7 }
 0x505   :  { %v1601_v45 = vrot.slane %v1583_v41, 4  ;;  %v1604_v62 = vsel %vm1195_vm9, %v1583_v41, %v1603_v1 }
 0x506   :  { %v1612_v2 = vperm.slane %v1604_v62, %v2302_v7 }
 0x507   :  { %v1602_v9 = vsel %vm1195_vm9, %v1601_v45, %v1519_v61 }
 0x508   :  { %v1608_v50 = vperm.slane %v1602_v9, %v2302_v7  ;;  %v1625_v10 = vrot.slane %v1612_v2, 4  ;;  %v1628_v18 = vsel %vm1195_vm9, %v1612_v2, %v1627_v8 }
 0x509   :  { %v1636_v19 = vperm.slane %v1628_v18, %v2348_v48 }
 0x50a   :  { %v1613_v25 = vrot.slane %v1608_v50, 4  ;;  %v1616_v57 = vsel %vm1195_vm9, %v1608_v50, %v1615_v43  ;;  %v1626_v17 = vsel %vm1195_vm9, %v1625_v10, %v1600_v60 }
 0x50b   :  { %v1624_v23 = vperm.slane %v1616_v57, %v2348_v48  ;;  %v1632_v22 = vperm.slane %v1626_v17, %v2348_v48  ;;  %v1643_v37 = vrot.slane %v1636_v19, 4 }
 0x50c   :  { %v1614_v4 = vsel %vm1195_vm9, %v1613_v25, %v1596_v55  ;;  %v1586_v21 = vpop.f32.mrf.mxu1 }
 0x50d   :  { %v1620_v27 = vperm.slane %v1614_v4, %v2348_v48  ;;  %v1639_v13 = vrot.slane %v1624_v23, 4  ;;  %v1641_v32 = vrot.slane %v1632_v22, 4  ;;  %v1644_v34 = vsel %vm1195_vm9, 0.0, %v1643_v37 }
 0x50e   :  { %v1674_v58 = vsel %vm1195_vm9, %v1643_v37, %v1632_v22  ;;  %v1679_v38 = vrot.slane %v1644_v34, 4  ;;  %v1651_v31 = vrot.slane %v1586_v21, 4 }
 0x50f   :  { %v1637_v29 = vrot.slane %v1620_v27, 4  ;;  %v1640_v46 = vsel %vm1195_vm9, 0.0, %v1639_v13  ;;  %v1642_v33 = vsel %vm1195_vm9, 0.0, %v1641_v32  ;;  %v1678_v42 = vperm.slane %v1674_v58, %v2302_v7 }
 0x510   :  { %v1668_v30 = vrot.slane %v1640_v46, 4  ;;  %v1652_v39 = vsel %vm1195_vm9, %v1651_v31, %v1522_v28  ;;  %v1663_v0 = vsel %vm1195_vm9, %v1639_v13, %v1620_v27  ;;  %v1680_v15 = vsel %vm1195_vm9, %v1679_v38, %v1642_v33 }
 0x511   :  { %v1656_v63 = vperm.slane %v1652_v39, %v2302_v7  ;;  %v1638_v44 = vsel %vm1195_vm9, 0.0, %v1637_v29  ;;  %v1667_v59 = vperm.slane %v1663_v0, %v2302_v7  ;;  %v1684_v5 = vperm.slane %v1680_v15, %v2302_v7 }
 0x512   :  { %v1669_v16 = vsel %vm1195_vm9, %v1668_v30, %v1638_v44  ;;  %v1699_v3 = vrot.slane %v1678_v42, 4 }
 0x513   :  { %v1657_v26 = vrot.slane %v1656_v63, 4  ;;  %v1673_v24 = vperm.slane %v1669_v16, %v2302_v7  ;;  %v1687_v6 = vrot.slane %v1667_v59, 4  ;;  %v1697_v36 = vrot.slane %v1684_v5, 4 }
 0x514   :  { %v1700_v35 = vsel %vm1195_vm9, %v1684_v5, %v1699_v3 }
 0x515   :  { %v1658_v52 = vsel %vm1195_vm9, %v1657_v26, %v1650_v12  ;;  %v1688_v51 = vsel %vm1195_vm9, %v1673_v24, %v1687_v6  ;;  %v1708_v49 = vperm.slane %v1700_v35, %v2348_v48  ;;  %v1685_v11 = vrot.slane %v1673_v24, 4 }
 0x516   :  { %v1662_v47 = vperm.slane %v1658_v52, %v2348_v48  ;;  %v1696_v54 = vperm.slane %v1688_v51, %v2348_v48  ;;  %v1698_v56 = vsel %vm1195_vm9, %v1697_v36, %v1678_v42 }
 0x517   :  { %v1713_v61 = vrot.slane %v1708_v49, 4  ;;  %v1686_v40 = vsel %vm1195_vm9, %v1685_v11, %v1667_v59  ;;  %v1704_v60 = vperm.slane %v1698_v56, %v2348_v48 }
 0x518   :  { %v1715_v1 = vrot.slane %v1696_v54, 4  ;;  %v1692_v55 = vperm.slane %v1686_v40, %v2348_v48  ;;  %v1721_v41 = vrot.slane %v1662_v47, 4  ;;  %v1720_v43 = vperm.slane %v1662_v47, %v2302_v7 }
 0x519   :  { %v1714_v45 = vsel %vm1195_vm9, %v1713_v61, %v1696_v54  ;;  %v1709_v62 = vrot.slane %v1704_v60, 4 }
 0x51a   :  { %1753 = vrot.lane.b32.xlu0 %v1714_v45, %s1876_s24  ;;  %v1716_v8 = vsel %vm1195_vm9, %v1708_v49, %v1715_v1  ;;  %v1722_v2 = vsel %vm1195_vm9, 0.0, %v1721_v41  ;;  %v1711_v9 = vrot.slane %v1692_v55, 4  ;;  %v1729_v18 = vrot.slane %v1720_v43, 4 }
 0x51b   :  { %1761 = vrot.lane.b32.xlu1 %v1716_v8, %s1877_s25  ;;  %v1710_v20 = vsel %vm1195_vm9, %v1709_v62, %v1692_v55  ;;  %v1726_v50 = vperm.slane %v1722_v2, %v2302_v7 }
 0x51c   :  { %v1712_v10 = vsel %vm1195_vm9, %v1704_v60, %v1711_v9 }
 0x51d   :  { %v1727_v19 = vrot.slane %v1726_v50, 4  ;;  %v1730_v14 = vsel %vm1195_vm9, %v1726_v50, %v1729_v18 }
 0x51e   :  { %v1738_v57 = vperm.slane %v1730_v14, %v2348_v48 }
 0x51f   :  { %v1728_v25 = vsel %vm1195_vm9, %v1727_v19, %v1720_v43 }
 0x520   :  { %v1734_v17 = vperm.slane %v1728_v25, %v2348_v48  ;;  %v1741_v7 = vrot.slane %v1738_v57, 4 }
 0x522   :  { %1745 = vrot.lane.b32.xlu0 %v1712_v10, %s1878_s26  ;;  %v1739_v23 = vrot.slane %v1734_v17, 4  ;;  %v1742_v37 = vsel %vm1195_vm9, 0.0, %v1741_v7 }
 0x524   :  { %v1740_v22 = vsel %vm1195_vm9, 0.0, %v1739_v23 }
 0x52a   :  { %1755 = vrot.lane.b32.xlu0 %v1738_v57, %s1876_s24 }
 0x532   :  { %1747 = vrot.lane.b32.xlu0 %v1740_v22, %s1878_s26 }
 0x53a   :  { %1763 = vrot.lane.b32.xlu0 %v1742_v37, %s1877_s25 }
 0x58c   :  { %v1754_v4 = vpop.permute.xlu0 %1753 }
 0x58d   :  { %v1762_v13 = vpop.permute.xlu1 %1761 }
 0x594   :  { %v1746_v21 = vpop.permute.xlu0 %1745 }
 0x595   :  { %v1768_v27 = vsel %vm1767_vm2, %v1710_v20, %v1746_v21 }
 0x596   :  { %v1770_v32 = vsel %vm31_vm0, %v1768_v27, %v1754_v4 }
 0x597   :  { %v1773_v34 = vsel %vm1772_vm5, %v1770_v32, %v1762_v13 }
 0x598   :  { %1775 = vst.msk [vmem:[%s2621_s6] sm:$0xff] %vm65_vm1, %v1773_v34 }
 0x59c   :  { %v1756_v48 = vpop.permute.xlu0 %1755 }
 0x5a4   :  { %v1748_v53 = vpop.permute.xlu0 %1747 }
 0x5a5   :  { %v1769_v58 = vsel %vm1767_vm2, %v1734_v17, %v1748_v53 }
 0x5a6   :  { %v1771_v38 = vsel %vm31_vm0, %v1769_v58, %v1756_v48 }
 0x5ac   :  { %v1764_v31 = vpop.permute.xlu0 %1763 }
 0x5ad   :  { %v1774_v28 = vsel %vm1772_vm5, %v1771_v38, %v1764_v31 }
 0x5ae   :  { %1777 = vst.msk [vmem:[%s2621_s6 + $0x8] sm:$0x3] %vm1776_vm6, %v1774_v28 }

</bundles_post_ra>
